<compile_context>
chip_gen: v7x
topology: tpu7x:2x2x1
jax: 0.10.0
libtpu: 0.0.40
codegen_flags: <defaults>
</compile_context>

<pallas_src>
import jax
import jax.numpy as jnp
import numpy as np
from jax.experimental import pallas as pl
from jax.experimental.pallas import tpu as pltpu


_LANES = 128   # TPU lane width: scratch tiles are exactly one lane tile wide.
_BCAP = 6      # batch-block cap (vreg pressure: acc + base + tap stay well under 64).


def _fused_convt_kernel(x_ref, w1_ref, w2_ref, b_ref, o_ref, s_ref):
    """Fused conv_t1 (1x1) + conv_t2 (3x3 transposed, bias) for a block of B batch elems.

    x_ref : VMEM (B, 3, H, W)        input block
    w1_ref: SMEM (3,)                conv_t1 weight  W1[c, 0, 0, 0]
    w2_ref: SMEM (27,)               conv_t2 weight  W2[0, o, kh, kw] flat as (o, kh, kw)
    b_ref : SMEM (3,)                conv_t2 bias
    o_ref : VMEM (B, 3, Ho, Wo)      output block (Ho = H+2, Wo = W+2), unpadded
    s_ref : VMEM (3, B, HS, 128)     three row-shifted, zero-padded copies of v1
    """
    B, _, H, W = x_ref.shape
    _, _, Ho, Wo = o_ref.shape
    HS = s_ref.shape[2]

    # ---- conv_t1: 1x1 transposed conv == per-pixel channel-weighted sum ------------
    x = x_ref[...].astype(jnp.float32)                                   # (B, 3, H, W)
    v1 = x[:, 0] * w1_ref[0] + x[:, 1] * w1_ref[1] + x[:, 2] * w1_ref[2]  # (B, H, W)

    # ---- stage v1 into three row-shifted, zero-padded copies -----------------------
    # Copy kh holds v1 at row offset kh (the sublane shift is done once, here, by the
    # store); lanes [0, W).  Everything else is zero.  The kw shift is then a cheap
    # lane roll on an exactly-128-lane tile in the tap loop -- no tile-boundary
    # crossing slices in the hot loop.
    # NOTE: scratch must be re-zeroed every step -- with dimension_semantics
    # ("parallel",) a program_id==0 gated init would never run on the second core.
    s_ref[...] = jnp.zeros_like(s_ref)
    for kh in range(3):
        s_ref[kh, :, kh:kh + H, :W] = v1

    # ---- hoist all scalar parameter reads out of the accumulation loops ------------
    w2 = [[[w2_ref[o * 9 + kh * 3 + kw] for kw in range(3)]
           for kh in range(3)] for o in range(3)]

    # ---- conv_t2: 3x3 transposed conv (stride 1) ------------------------------------
    #   out[o, y, x] = bias[o] + sum_{kh,kw} v1[y-kh, x-kw] * W2[o, kh, kw]
    # Copy kh already has the row shift baked in; the lane shift is a roll:
    #   tap[y, x] = s[kh][y, (x - kw) mod 128] = v1[y - kh, x - kw]   for x < Wo
    # (wrap-around only lands in lanes >= 126, which requires W <= 126 and is
    #  discarded by the [:Wo] store anyway).
    # Channel-outer keeps only one accumulator live (low vreg pressure even at B=6);
    # the extra rolls sit on the XLU slot and co-issue with the VPU multiply-adds.
    for o in range(3):
        acc = jnp.full((B, HS, _LANES), b_ref[o], dtype=jnp.float32)   # bias-init
        for kh in range(3):
            base = s_ref[kh]                                           # (B, HS, 128)
            for kw in range(3):
                tap = base if kw == 0 else pltpu.roll(base, shift=kw, axis=2)
                acc = acc + tap * w2[o][kh][kw]
        # Masked store of the valid (Ho, Wo) window only (lane-dense padding dropped).
        o_ref[:, o, :, :] = acc[:, :Ho, :Wo].astype(o_ref.dtype)


def _tensorcores_per_chip() -> int:
    """Best-effort TensorCores-per-chip: 2 on megacore chips (v7x/v5p/v4), else 1."""
    try:
        kind = jax.devices()[0].device_kind.lower()
    except Exception:
        return 1
    if "v7" in kind or "7x" in kind or "v5p" in kind or "v4" in kind:
        return 2
    return 1


def model_forward(x, w1, w2, b2):
    """x: (N, 3, H, W) f32 NCHW.  Returns (N, 3, H+2, W+2) f32."""
    N, C, H, W = x.shape
    assert C == 3
    # TODO(synk): very wide inputs (W > 126) would need lane tiling of W.
    assert W <= 126
    Ho, Wo = H + 2, W + 2
    HS = ((H + 2 + 7) // 8) * 8            # sublane-rounded scratch height (>= H+2)

    # Generation-aware batch blocking:
    #  - 1 TensorCore (v5e/v6e): the grid is a serial loop -> one step if possible.
    #  - 2 TensorCores (v7x):    keep >= num_cores steps so megacore sharding helps.
    ncores = _tensorcores_per_chip()
    b_target = pl.cdiv(N, ncores) if ncores > 1 else N
    B = max(1, min(_BCAP, b_target, N))
    G = pl.cdiv(N, B)
    Npad = G * B
    if Npad != N:
        x = jnp.pad(x, ((0, Npad - N), (0, 0), (0, 0), (0, 0)))

    w1_flat = w1.reshape(3).astype(jnp.float32)    # (in=3, out=1, 1, 1) -> (3,)
    w2_flat = w2.reshape(27).astype(jnp.float32)   # (in=1, out=3, 3, 3) -> (o, kh, kw)
    b2_flat = b2.reshape(3).astype(jnp.float32)

    out = pl.pallas_call(
        _fused_convt_kernel,
        out_shape=jax.ShapeDtypeStruct((Npad, 3, Ho, Wo), x.dtype),
        grid=(G,),
        in_specs=[
            pl.BlockSpec((B, 3, H, W), lambda n: (n, 0, 0, 0)),
            pl.BlockSpec(memory_space=pltpu.MemorySpace.SMEM),
            pl.BlockSpec(memory_space=pltpu.MemorySpace.SMEM),
            pl.BlockSpec(memory_space=pltpu.MemorySpace.SMEM),
        ],
        out_specs=pl.BlockSpec((B, 3, Ho, Wo), lambda n: (n, 0, 0, 0)),
        scratch_shapes=[pltpu.VMEM((3, B, HS, _LANES), jnp.float32)],
        compiler_params=pltpu.CompilerParams(dimension_semantics=("parallel",)),
    )(x, w1_flat, w2_flat, b2_flat)

    # No slice in the common case (N divisible by B); only trim batch padding if any.
    return out if Npad == N else out[:N]


def reference_forward(x, w1, w2, b2):
    """Pure-JAX reference of the (fixed) module forward."""
    # conv_t1: 1x1, 3 -> 1, no bias
    v1 = jnp.einsum("nchw,c->nhw", x, w1.reshape(3))[:, None]   # (N, 1, H, W)
    # conv_t2: transposed conv == correlation of flipped kernel over input padded by k-1
    w2k = w2[0]                        # (3, 3, 3) = (o, kh, kw)
    w2f = w2k[:, ::-1, ::-1][:, None]  # (O=3, I=1, kh, kw), flipped
    v1p = jnp.pad(v1, ((0, 0), (0, 0), (2, 2), (2, 2)))
    out = jax.lax.conv_general_dilated(
        v1p, w2f, window_strides=(1, 1), padding="VALID",
        dimension_numbers=("NCHW", "OIHW", "NCHW"))
    return out + b2.reshape(1, 3, 1, 1)


if __name__ == "__main__":
    key = jax.random.PRNGKey(0)
    k_x, k_w1, k_w2, k_b = jax.random.split(key, 4)

    # Shapes follow the module's example input x1 = torch.FloatTensor(6, 3, 7, 7).
    N, C, H, W = 6, 3, 7, 7
    x = jax.random.normal(k_x, (N, C, H, W), dtype=jnp.float32)

    # Deterministic parameter init (PyTorch ConvTranspose2d weight conventions).
    w1 = jax.random.normal(k_w1, (3, 1, 1, 1), dtype=jnp.float32) * 0.5   # conv_t1.weight
    w2 = jax.random.normal(k_w2, (1, 3, 3, 3), dtype=jnp.float32) * 0.3   # conv_t2.weight
    b2 = jax.random.normal(k_b, (3,), dtype=jnp.float32) * 0.1            # conv_t2.bias

    out = jax.block_until_ready(model_forward(x, w1, w2, b2))
    ref = jax.block_until_ready(reference_forward(x, w1, w2, b2))

    assert out.shape == (N, 3, H + 2, W + 2), out.shape
    np.testing.assert_allclose(np.asarray(out), np.asarray(ref), rtol=1e-5, atol=1e-5)
    print("KERNEL_OK")
</pallas_src>

<mosaic_0001>
module attributes {stable_mosaic.version = 11 : i64} {
  func.func @_fused_convt_kernel(%arg0: i32, %arg1: memref<6x3x7x7xf32, #tpu.memory_space<vmem>>, %arg2: memref<3xf32, #tpu.memory_space<smem>>, %arg3: memref<27xf32, #tpu.memory_space<smem>>, %arg4: memref<3xf32, #tpu.memory_space<smem>>, %arg5: memref<6x3x9x9xf32, #tpu.memory_space<vmem>>, %arg6: memref<3x6x16x128xf32, #tpu.memory_space<vmem>>) attributes {dimension_semantics = [#tpu.dimension_semantics<parallel>], iteration_bounds = array<i64: 1>, scalar_prefetch = 0 : i64, scratch_operands = 1 : i64, tpu.core_type = #tpu.core_type<tc>, window_params = [{transform_indices = @transform_0, window_bounds = array<i64: 6, 3, 7, 7>}, {transform_indices = @transform_1, window_bounds = array<i64: 3>}, {transform_indices = @transform_2, window_bounds = array<i64: 27>}, {transform_indices = @transform_3, window_bounds = array<i64: 3>}, {transform_indices = @transform_4, window_bounds = array<i64: 6, 3, 9, 9>}]} {
    %c0 = arith.constant 0 : index
    %c0_0 = arith.constant 0 : index
    %c0_1 = arith.constant 0 : index
    %c0_2 = arith.constant 0 : index
    %0 = vector.load %arg1[%c0, %c0_0, %c0_1, %c0_2] : memref<6x3x7x7xf32, #tpu.memory_space<vmem>>, vector<6x3x7x7xf32>
    %1 = vector.extract_strided_slice %0 {offsets = [0, 0, 0, 0], sizes = [6, 1, 7, 7], strides = [1, 1, 1, 1]} : vector<6x3x7x7xf32> to vector<6x1x7x7xf32>
    %2 = vector.shape_cast %1 : vector<6x1x7x7xf32> to vector<6x7x7xf32>
    %c0_3 = arith.constant 0 : index
    %3 = memref.load %arg2[%c0_3] : memref<3xf32, #tpu.memory_space<smem>>
    %4 = vector.broadcast %3 : f32 to vector<6x7x7xf32>
    %5 = arith.mulf %2, %4 : vector<6x7x7xf32>
    %6 = vector.extract_strided_slice %0 {offsets = [0, 1, 0, 0], sizes = [6, 1, 7, 7], strides = [1, 1, 1, 1]} : vector<6x3x7x7xf32> to vector<6x1x7x7xf32>
    %7 = vector.shape_cast %6 : vector<6x1x7x7xf32> to vector<6x7x7xf32>
    %c1 = arith.constant 1 : index
    %8 = memref.load %arg2[%c1] : memref<3xf32, #tpu.memory_space<smem>>
    %9 = vector.broadcast %8 : f32 to vector<6x7x7xf32>
    %10 = arith.mulf %7, %9 : vector<6x7x7xf32>
    %11 = arith.addf %5, %10 : vector<6x7x7xf32>
    %12 = vector.extract_strided_slice %0 {offsets = [0, 2, 0, 0], sizes = [6, 1, 7, 7], strides = [1, 1, 1, 1]} : vector<6x3x7x7xf32> to vector<6x1x7x7xf32>
    %13 = vector.shape_cast %12 : vector<6x1x7x7xf32> to vector<6x7x7xf32>
    %c2 = arith.constant 2 : index
    %14 = memref.load %arg2[%c2] : memref<3xf32, #tpu.memory_space<smem>>
    %15 = vector.broadcast %14 : f32 to vector<6x7x7xf32>
    %16 = arith.mulf %13, %15 : vector<6x7x7xf32>
    %17 = arith.addf %11, %16 : vector<6x7x7xf32>
    %cst = arith.constant 0.000000e+00 : f32
    %18 = vector.broadcast %cst : f32 to vector<3x6x16x128xf32>
    %c0_4 = arith.constant 0 : index
    %c0_5 = arith.constant 0 : index
    %c0_6 = arith.constant 0 : index
    %c0_7 = arith.constant 0 : index
    %19 = vector.load %arg6[%c0_4, %c0_5, %c0_6, %c0_7] : memref<3x6x16x128xf32, #tpu.memory_space<vmem>>, vector<3x6x16x128xf32>
    tpu.vector_store %arg6[%c0_4, %c0_5, %c0_6, %c0_7], %18 {strides = array<i32>} : memref<3x6x16x128xf32, #tpu.memory_space<vmem>>, vector<3x6x16x128xf32>,
    %c0_8 = arith.constant 0 : index
    %c0_9 = arith.constant 0 : index
    %c0_10 = arith.constant 0 : index
    %c0_11 = arith.constant 0 : index
    %20 = vector.load %arg6[%c0_8, %c0_9, %c0_10, %c0_11] : memref<3x6x16x128xf32, #tpu.memory_space<vmem>>, vector<1x6x7x7xf32>
    %21 = vector.shape_cast %20 : vector<1x6x7x7xf32> to vector<6x7x7xf32>
    %22 = vector.shape_cast %17 : vector<6x7x7xf32> to vector<1x6x7x7xf32>
    tpu.vector_store %arg6[%c0_8, %c0_9, %c0_10, %c0_11], %22 {strides = array<i32>} : memref<3x6x16x128xf32, #tpu.memory_space<vmem>>, vector<1x6x7x7xf32>,
    %c1_12 = arith.constant 1 : index
    %c0_13 = arith.constant 0 : index
    %c1_14 = arith.constant 1 : index
    %c0_15 = arith.constant 0 : index
    %23 = vector.load %arg6[%c1_12, %c0_13, %c1_14, %c0_15] : memref<3x6x16x128xf32, #tpu.memory_space<vmem>>, vector<1x6x7x7xf32>
    %24 = vector.shape_cast %23 : vector<1x6x7x7xf32> to vector<6x7x7xf32>
    %25 = vector.shape_cast %17 : vector<6x7x7xf32> to vector<1x6x7x7xf32>
    tpu.vector_store %arg6[%c1_12, %c0_13, %c1_14, %c0_15], %25 {strides = array<i32>} : memref<3x6x16x128xf32, #tpu.memory_space<vmem>>, vector<1x6x7x7xf32>,
    %c2_16 = arith.constant 2 : index
    %c0_17 = arith.constant 0 : index
    %c2_18 = arith.constant 2 : index
    %c0_19 = arith.constant 0 : index
    %26 = vector.load %arg6[%c2_16, %c0_17, %c2_18, %c0_19] : memref<3x6x16x128xf32, #tpu.memory_space<vmem>>, vector<1x6x7x7xf32>
    %27 = vector.shape_cast %26 : vector<1x6x7x7xf32> to vector<6x7x7xf32>
    %28 = vector.shape_cast %17 : vector<6x7x7xf32> to vector<1x6x7x7xf32>
    tpu.vector_store %arg6[%c2_16, %c0_17, %c2_18, %c0_19], %28 {strides = array<i32>} : memref<3x6x16x128xf32, #tpu.memory_space<vmem>>, vector<1x6x7x7xf32>,
    %c0_20 = arith.constant 0 : index
    %29 = memref.load %arg3[%c0_20] : memref<27xf32, #tpu.memory_space<smem>>
    %c1_21 = arith.constant 1 : index
    %30 = memref.load %arg3[%c1_21] : memref<27xf32, #tpu.memory_space<smem>>
    %c2_22 = arith.constant 2 : index
    %31 = memref.load %arg3[%c2_22] : memref<27xf32, #tpu.memory_space<smem>>
    %c3 = arith.constant 3 : index
    %32 = memref.load %arg3[%c3] : memref<27xf32, #tpu.memory_space<smem>>
    %c4 = arith.constant 4 : index
    %33 = memref.load %arg3[%c4] : memref<27xf32, #tpu.memory_space<smem>>
    %c5 = arith.constant 5 : index
    %34 = memref.load %arg3[%c5] : memref<27xf32, #tpu.memory_space<smem>>
    %c6 = arith.constant 6 : index
    %35 = memref.load %arg3[%c6] : memref<27xf32, #tpu.memory_space<smem>>
    %c7 = arith.constant 7 : index
    %36 = memref.load %arg3[%c7] : memref<27xf32, #tpu.memory_space<smem>>
    %c8 = arith.constant 8 : index
    %37 = memref.load %arg3[%c8] : memref<27xf32, #tpu.memory_space<smem>>
    %c9 = arith.constant 9 : index
    %38 = memref.load %arg3[%c9] : memref<27xf32, #tpu.memory_space<smem>>
    %c10 = arith.constant 10 : index
    %39 = memref.load %arg3[%c10] : memref<27xf32, #tpu.memory_space<smem>>
    %c11 = arith.constant 11 : index
    %40 = memref.load %arg3[%c11] : memref<27xf32, #tpu.memory_space<smem>>
    %c12 = arith.constant 12 : index
    %41 = memref.load %arg3[%c12] : memref<27xf32, #tpu.memory_space<smem>>
    %c13 = arith.constant 13 : index
    %42 = memref.load %arg3[%c13] : memref<27xf32, #tpu.memory_space<smem>>
    %c14 = arith.constant 14 : index
    %43 = memref.load %arg3[%c14] : memref<27xf32, #tpu.memory_space<smem>>
    %c15 = arith.constant 15 : index
    %44 = memref.load %arg3[%c15] : memref<27xf32, #tpu.memory_space<smem>>
    %c16 = arith.constant 16 : index
    %45 = memref.load %arg3[%c16] : memref<27xf32, #tpu.memory_space<smem>>
    %c17 = arith.constant 17 : index
    %46 = memref.load %arg3[%c17] : memref<27xf32, #tpu.memory_space<smem>>
    %c18 = arith.constant 18 : index
    %47 = memref.load %arg3[%c18] : memref<27xf32, #tpu.memory_space<smem>>
    %c19 = arith.constant 19 : index
    %48 = memref.load %arg3[%c19] : memref<27xf32, #tpu.memory_space<smem>>
    %c20 = arith.constant 20 : index
    %49 = memref.load %arg3[%c20] : memref<27xf32, #tpu.memory_space<smem>>
    %c21 = arith.constant 21 : index
    %50 = memref.load %arg3[%c21] : memref<27xf32, #tpu.memory_space<smem>>
    %c22 = arith.constant 22 : index
    %51 = memref.load %arg3[%c22] : memref<27xf32, #tpu.memory_space<smem>>
    %c23 = arith.constant 23 : index
    %52 = memref.load %arg3[%c23] : memref<27xf32, #tpu.memory_space<smem>>
    %c24 = arith.constant 24 : index
    %53 = memref.load %arg3[%c24] : memref<27xf32, #tpu.memory_space<smem>>
    %c25 = arith.constant 25 : index
    %54 = memref.load %arg3[%c25] : memref<27xf32, #tpu.memory_space<smem>>
    %c26 = arith.constant 26 : index
    %55 = memref.load %arg3[%c26] : memref<27xf32, #tpu.memory_space<smem>>
    %c0_23 = arith.constant 0 : index
    %56 = memref.load %arg4[%c0_23] : memref<3xf32, #tpu.memory_space<smem>>
    %57 = vector.broadcast %56 : f32 to vector<6x16x128xf32>
    %c0_24 = arith.constant 0 : index
    %c0_25 = arith.constant 0 : index
    %c0_26 = arith.constant 0 : index
    %c0_27 = arith.constant 0 : index
    %58 = vector.load %arg6[%c0_24, %c0_25, %c0_26, %c0_27] : memref<3x6x16x128xf32, #tpu.memory_space<vmem>>, vector<1x6x16x128xf32>
    %59 = vector.shape_cast %58 : vector<1x6x16x128xf32> to vector<6x16x128xf32>
    %60 = vector.broadcast %29 : f32 to vector<6x16x128xf32>
    %61 = arith.mulf %59, %60 : vector<6x16x128xf32>
    %62 = arith.addf %57, %61 : vector<6x16x128xf32>
    %c1_i32 = arith.constant 1 : i32
    %63 = tpu.dynamic_rotate %59 by %c1_i32 dim 2 : vector<6x16x128xf32>, i32 -> vector<6x16x128xf32>
    %64 = vector.broadcast %30 : f32 to vector<6x16x128xf32>
    %65 = arith.mulf %63, %64 : vector<6x16x128xf32>
    %66 = arith.addf %62, %65 : vector<6x16x128xf32>
    %c2_i32 = arith.constant 2 : i32
    %67 = tpu.dynamic_rotate %59 by %c2_i32 dim 2 : vector<6x16x128xf32>, i32 -> vector<6x16x128xf32>
    %68 = vector.broadcast %31 : f32 to vector<6x16x128xf32>
    %69 = arith.mulf %67, %68 : vector<6x16x128xf32>
    %70 = arith.addf %66, %69 : vector<6x16x128xf32>
    %c1_28 = arith.constant 1 : index
    %c0_29 = arith.constant 0 : index
    %c0_30 = arith.constant 0 : index
    %c0_31 = arith.constant 0 : index
    %71 = vector.load %arg6[%c1_28, %c0_29, %c0_30, %c0_31] : memref<3x6x16x128xf32, #tpu.memory_space<vmem>>, vector<1x6x16x128xf32>
    %72 = vector.shape_cast %71 : vector<1x6x16x128xf32> to vector<6x16x128xf32>
    %73 = vector.broadcast %32 : f32 to vector<6x16x128xf32>
    %74 = arith.mulf %72, %73 : vector<6x16x128xf32>
    %75 = arith.addf %70, %74 : vector<6x16x128xf32>
    %c1_i32_32 = arith.constant 1 : i32
    %76 = tpu.dynamic_rotate %72 by %c1_i32_32 dim 2 : vector<6x16x128xf32>, i32 -> vector<6x16x128xf32>
    %77 = vector.broadcast %33 : f32 to vector<6x16x128xf32>
    %78 = arith.mulf %76, %77 : vector<6x16x128xf32>
    %79 = arith.addf %75, %78 : vector<6x16x128xf32>
    %c2_i32_33 = arith.constant 2 : i32
    %80 = tpu.dynamic_rotate %72 by %c2_i32_33 dim 2 : vector<6x16x128xf32>, i32 -> vector<6x16x128xf32>
    %81 = vector.broadcast %34 : f32 to vector<6x16x128xf32>
    %82 = arith.mulf %80, %81 : vector<6x16x128xf32>
    %83 = arith.addf %79, %82 : vector<6x16x128xf32>
    %c2_34 = arith.constant 2 : index
    %c0_35 = arith.constant 0 : index
    %c0_36 = arith.constant 0 : index
    %c0_37 = arith.constant 0 : index
    %84 = vector.load %arg6[%c2_34, %c0_35, %c0_36, %c0_37] : memref<3x6x16x128xf32, #tpu.memory_space<vmem>>, vector<1x6x16x128xf32>
    %85 = vector.shape_cast %84 : vector<1x6x16x128xf32> to vector<6x16x128xf32>
    %86 = vector.broadcast %35 : f32 to vector<6x16x128xf32>
    %87 = arith.mulf %85, %86 : vector<6x16x128xf32>
    %88 = arith.addf %83, %87 : vector<6x16x128xf32>
    %c1_i32_38 = arith.constant 1 : i32
    %89 = tpu.dynamic_rotate %85 by %c1_i32_38 dim 2 : vector<6x16x128xf32>, i32 -> vector<6x16x128xf32>
    %90 = vector.broadcast %36 : f32 to vector<6x16x128xf32>
    %91 = arith.mulf %89, %90 : vector<6x16x128xf32>
    %92 = arith.addf %88, %91 : vector<6x16x128xf32>
    %c2_i32_39 = arith.constant 2 : i32
    %93 = tpu.dynamic_rotate %85 by %c2_i32_39 dim 2 : vector<6x16x128xf32>, i32 -> vector<6x16x128xf32>
    %94 = vector.broadcast %37 : f32 to vector<6x16x128xf32>
    %95 = arith.mulf %93, %94 : vector<6x16x128xf32>
    %96 = arith.addf %92, %95 : vector<6x16x128xf32>
    %97 = vector.extract_strided_slice %96 {offsets = [0, 0, 0], sizes = [6, 9, 9], strides = [1, 1, 1]} : vector<6x16x128xf32> to vector<6x9x9xf32>
    %c0_40 = arith.constant 0 : index
    %c0_41 = arith.constant 0 : index
    %c0_42 = arith.constant 0 : index
    %c0_43 = arith.constant 0 : index
    %98 = vector.load %arg5[%c0_40, %c0_41, %c0_42, %c0_43] : memref<6x3x9x9xf32, #tpu.memory_space<vmem>>, vector<6x1x9x9xf32>
    %99 = vector.shape_cast %98 : vector<6x1x9x9xf32> to vector<6x9x9xf32>
    %100 = vector.shape_cast %97 : vector<6x9x9xf32> to vector<6x1x9x9xf32>
    tpu.vector_store %arg5[%c0_40, %c0_41, %c0_42, %c0_43], %100 {strides = array<i32>} : memref<6x3x9x9xf32, #tpu.memory_space<vmem>>, vector<6x1x9x9xf32>,
    %c1_44 = arith.constant 1 : index
    %101 = memref.load %arg4[%c1_44] : memref<3xf32, #tpu.memory_space<smem>>
    %102 = vector.broadcast %101 : f32 to vector<6x16x128xf32>
    %c0_45 = arith.constant 0 : index
    %c0_46 = arith.constant 0 : index
    %c0_47 = arith.constant 0 : index
    %c0_48 = arith.constant 0 : index
    %103 = vector.load %arg6[%c0_45, %c0_46, %c0_47, %c0_48] : memref<3x6x16x128xf32, #tpu.memory_space<vmem>>, vector<1x6x16x128xf32>
    %104 = vector.shape_cast %103 : vector<1x6x16x128xf32> to vector<6x16x128xf32>
    %105 = vector.broadcast %38 : f32 to vector<6x16x128xf32>
    %106 = arith.mulf %104, %105 : vector<6x16x128xf32>
    %107 = arith.addf %102, %106 : vector<6x16x128xf32>
    %c1_i32_49 = arith.constant 1 : i32
    %108 = tpu.dynamic_rotate %104 by %c1_i32_49 dim 2 : vector<6x16x128xf32>, i32 -> vector<6x16x128xf32>
    %109 = vector.broadcast %39 : f32 to vector<6x16x128xf32>
    %110 = arith.mulf %108, %109 : vector<6x16x128xf32>
    %111 = arith.addf %107, %110 : vector<6x16x128xf32>
    %c2_i32_50 = arith.constant 2 : i32
    %112 = tpu.dynamic_rotate %104 by %c2_i32_50 dim 2 : vector<6x16x128xf32>, i32 -> vector<6x16x128xf32>
    %113 = vector.broadcast %40 : f32 to vector<6x16x128xf32>
    %114 = arith.mulf %112, %113 : vector<6x16x128xf32>
    %115 = arith.addf %111, %114 : vector<6x16x128xf32>
    %c1_51 = arith.constant 1 : index
    %c0_52 = arith.constant 0 : index
    %c0_53 = arith.constant 0 : index
    %c0_54 = arith.constant 0 : index
    %116 = vector.load %arg6[%c1_51, %c0_52, %c0_53, %c0_54] : memref<3x6x16x128xf32, #tpu.memory_space<vmem>>, vector<1x6x16x128xf32>
    %117 = vector.shape_cast %116 : vector<1x6x16x128xf32> to vector<6x16x128xf32>
    %118 = vector.broadcast %41 : f32 to vector<6x16x128xf32>
    %119 = arith.mulf %117, %118 : vector<6x16x128xf32>
    %120 = arith.addf %115, %119 : vector<6x16x128xf32>
    %c1_i32_55 = arith.constant 1 : i32
    %121 = tpu.dynamic_rotate %117 by %c1_i32_55 dim 2 : vector<6x16x128xf32>, i32 -> vector<6x16x128xf32>
    %122 = vector.broadcast %42 : f32 to vector<6x16x128xf32>
    %123 = arith.mulf %121, %122 : vector<6x16x128xf32>
    %124 = arith.addf %120, %123 : vector<6x16x128xf32>
    %c2_i32_56 = arith.constant 2 : i32
    %125 = tpu.dynamic_rotate %117 by %c2_i32_56 dim 2 : vector<6x16x128xf32>, i32 -> vector<6x16x128xf32>
    %126 = vector.broadcast %43 : f32 to vector<6x16x128xf32>
    %127 = arith.mulf %125, %126 : vector<6x16x128xf32>
    %128 = arith.addf %124, %127 : vector<6x16x128xf32>
    %c2_57 = arith.constant 2 : index
    %c0_58 = arith.constant 0 : index
    %c0_59 = arith.constant 0 : index
    %c0_60 = arith.constant 0 : index
    %129 = vector.load %arg6[%c2_57, %c0_58, %c0_59, %c0_60] : memref<3x6x16x128xf32, #tpu.memory_space<vmem>>, vector<1x6x16x128xf32>
    %130 = vector.shape_cast %129 : vector<1x6x16x128xf32> to vector<6x16x128xf32>
    %131 = vector.broadcast %44 : f32 to vector<6x16x128xf32>
    %132 = arith.mulf %130, %131 : vector<6x16x128xf32>
    %133 = arith.addf %128, %132 : vector<6x16x128xf32>
    %c1_i32_61 = arith.constant 1 : i32
    %134 = tpu.dynamic_rotate %130 by %c1_i32_61 dim 2 : vector<6x16x128xf32>, i32 -> vector<6x16x128xf32>
    %135 = vector.broadcast %45 : f32 to vector<6x16x128xf32>
    %136 = arith.mulf %134, %135 : vector<6x16x128xf32>
    %137 = arith.addf %133, %136 : vector<6x16x128xf32>
    %c2_i32_62 = arith.constant 2 : i32
    %138 = tpu.dynamic_rotate %130 by %c2_i32_62 dim 2 : vector<6x16x128xf32>, i32 -> vector<6x16x128xf32>
    %139 = vector.broadcast %46 : f32 to vector<6x16x128xf32>
    %140 = arith.mulf %138, %139 : vector<6x16x128xf32>
    %141 = arith.addf %137, %140 : vector<6x16x128xf32>
    %142 = vector.extract_strided_slice %141 {offsets = [0, 0, 0], sizes = [6, 9, 9], strides = [1, 1, 1]} : vector<6x16x128xf32> to vector<6x9x9xf32>
    %c0_63 = arith.constant 0 : index
    %c1_64 = arith.constant 1 : index
    %c0_65 = arith.constant 0 : index
    %c0_66 = arith.constant 0 : index
    %143 = vector.load %arg5[%c0_63, %c1_64, %c0_65, %c0_66] : memref<6x3x9x9xf32, #tpu.memory_space<vmem>>, vector<6x1x9x9xf32>
    %144 = vector.shape_cast %143 : vector<6x1x9x9xf32> to vector<6x9x9xf32>
    %145 = vector.shape_cast %142 : vector<6x9x9xf32> to vector<6x1x9x9xf32>
    tpu.vector_store %arg5[%c0_63, %c1_64, %c0_65, %c0_66], %145 {strides = array<i32>} : memref<6x3x9x9xf32, #tpu.memory_space<vmem>>, vector<6x1x9x9xf32>,
    %c2_67 = arith.constant 2 : index
    %146 = memref.load %arg4[%c2_67] : memref<3xf32, #tpu.memory_space<smem>>
    %147 = vector.broadcast %146 : f32 to vector<6x16x128xf32>
    %c0_68 = arith.constant 0 : index
    %c0_69 = arith.constant 0 : index
    %c0_70 = arith.constant 0 : index
    %c0_71 = arith.constant 0 : index
    %148 = vector.load %arg6[%c0_68, %c0_69, %c0_70, %c0_71] : memref<3x6x16x128xf32, #tpu.memory_space<vmem>>, vector<1x6x16x128xf32>
    %149 = vector.shape_cast %148 : vector<1x6x16x128xf32> to vector<6x16x128xf32>
    %150 = vector.broadcast %47 : f32 to vector<6x16x128xf32>
    %151 = arith.mulf %149, %150 : vector<6x16x128xf32>
    %152 = arith.addf %147, %151 : vector<6x16x128xf32>
    %c1_i32_72 = arith.constant 1 : i32
    %153 = tpu.dynamic_rotate %149 by %c1_i32_72 dim 2 : vector<6x16x128xf32>, i32 -> vector<6x16x128xf32>
    %154 = vector.broadcast %48 : f32 to vector<6x16x128xf32>
    %155 = arith.mulf %153, %154 : vector<6x16x128xf32>
    %156 = arith.addf %152, %155 : vector<6x16x128xf32>
    %c2_i32_73 = arith.constant 2 : i32
    %157 = tpu.dynamic_rotate %149 by %c2_i32_73 dim 2 : vector<6x16x128xf32>, i32 -> vector<6x16x128xf32>
    %158 = vector.broadcast %49 : f32 to vector<6x16x128xf32>
    %159 = arith.mulf %157, %158 : vector<6x16x128xf32>
    %160 = arith.addf %156, %159 : vector<6x16x128xf32>
    %c1_74 = arith.constant 1 : index
    %c0_75 = arith.constant 0 : index
    %c0_76 = arith.constant 0 : index
    %c0_77 = arith.constant 0 : index
    %161 = vector.load %arg6[%c1_74, %c0_75, %c0_76, %c0_77] : memref<3x6x16x128xf32, #tpu.memory_space<vmem>>, vector<1x6x16x128xf32>
    %162 = vector.shape_cast %161 : vector<1x6x16x128xf32> to vector<6x16x128xf32>
    %163 = vector.broadcast %50 : f32 to vector<6x16x128xf32>
    %164 = arith.mulf %162, %163 : vector<6x16x128xf32>
    %165 = arith.addf %160, %164 : vector<6x16x128xf32>
    %c1_i32_78 = arith.constant 1 : i32
    %166 = tpu.dynamic_rotate %162 by %c1_i32_78 dim 2 : vector<6x16x128xf32>, i32 -> vector<6x16x128xf32>
    %167 = vector.broadcast %51 : f32 to vector<6x16x128xf32>
    %168 = arith.mulf %166, %167 : vector<6x16x128xf32>
    %169 = arith.addf %165, %168 : vector<6x16x128xf32>
    %c2_i32_79 = arith.constant 2 : i32
    %170 = tpu.dynamic_rotate %162 by %c2_i32_79 dim 2 : vector<6x16x128xf32>, i32 -> vector<6x16x128xf32>
    %171 = vector.broadcast %52 : f32 to vector<6x16x128xf32>
    %172 = arith.mulf %170, %171 : vector<6x16x128xf32>
    %173 = arith.addf %169, %172 : vector<6x16x128xf32>
    %c2_80 = arith.constant 2 : index
    %c0_81 = arith.constant 0 : index
    %c0_82 = arith.constant 0 : index
    %c0_83 = arith.constant 0 : index
    %174 = vector.load %arg6[%c2_80, %c0_81, %c0_82, %c0_83] : memref<3x6x16x128xf32, #tpu.memory_space<vmem>>, vector<1x6x16x128xf32>
    %175 = vector.shape_cast %174 : vector<1x6x16x128xf32> to vector<6x16x128xf32>
    %176 = vector.broadcast %53 : f32 to vector<6x16x128xf32>
    %177 = arith.mulf %175, %176 : vector<6x16x128xf32>
    %178 = arith.addf %173, %177 : vector<6x16x128xf32>
    %c1_i32_84 = arith.constant 1 : i32
    %179 = tpu.dynamic_rotate %175 by %c1_i32_84 dim 2 : vector<6x16x128xf32>, i32 -> vector<6x16x128xf32>
    %180 = vector.broadcast %54 : f32 to vector<6x16x128xf32>
    %181 = arith.mulf %179, %180 : vector<6x16x128xf32>
    %182 = arith.addf %178, %181 : vector<6x16x128xf32>
    %c2_i32_85 = arith.constant 2 : i32
    %183 = tpu.dynamic_rotate %175 by %c2_i32_85 dim 2 : vector<6x16x128xf32>, i32 -> vector<6x16x128xf32>
    %184 = vector.broadcast %55 : f32 to vector<6x16x128xf32>
    %185 = arith.mulf %183, %184 : vector<6x16x128xf32>
    %186 = arith.addf %182, %185 : vector<6x16x128xf32>
    %187 = vector.extract_strided_slice %186 {offsets = [0, 0, 0], sizes = [6, 9, 9], strides = [1, 1, 1]} : vector<6x16x128xf32> to vector<6x9x9xf32>
    %c0_86 = arith.constant 0 : index
    %c2_87 = arith.constant 2 : index
    %c0_88 = arith.constant 0 : index
    %c0_89 = arith.constant 0 : index
    %188 = vector.load %arg5[%c0_86, %c2_87, %c0_88, %c0_89] : memref<6x3x9x9xf32, #tpu.memory_space<vmem>>, vector<6x1x9x9xf32>
    %189 = vector.shape_cast %188 : vector<6x1x9x9xf32> to vector<6x9x9xf32>
    %190 = vector.shape_cast %187 : vector<6x9x9xf32> to vector<6x1x9x9xf32>
    tpu.vector_store %arg5[%c0_86, %c2_87, %c0_88, %c0_89], %190 {strides = array<i32>} : memref<6x3x9x9xf32, #tpu.memory_space<vmem>>, vector<6x1x9x9xf32>,
    return
  }
  func.func @transform_0(%arg0: i32) -> (i32, i32, i32, i32) {
    %c0_i32 = arith.constant 0 : i32
    %c0_i32_0 = arith.constant 0 : i32
    %c0_i32_1 = arith.constant 0 : i32
    %c0_i32_2 = arith.constant 0 : i32
    return %arg0, %c0_i32, %c0_i32_0, %c0_i32_1 : i32, i32, i32, i32
  }
  func.func @transform_1(%arg0: i32) -> i32 {
    %c0_i32 = arith.constant 0 : i32
    %c0_i32_0 = arith.constant 0 : i32
    return %c0_i32 : i32
  }
  func.func @transform_2(%arg0: i32) -> i32 {
    %c0_i32 = arith.constant 0 : i32
    %c0_i32_0 = arith.constant 0 : i32
    return %c0_i32 : i32
  }
  func.func @transform_3(%arg0: i32) -> i32 {
    %c0_i32 = arith.constant 0 : i32
    %c0_i32_0 = arith.constant 0 : i32
    return %c0_i32 : i32
  }
  func.func @transform_4(%arg0: i32) -> (i32, i32, i32, i32) {
    %c0_i32 = arith.constant 0 : i32
    %c0_i32_0 = arith.constant 0 : i32
    %c0_i32_1 = arith.constant 0 : i32
    %c0_i32_2 = arith.constant 0 : i32
    return %arg0, %c0_i32, %c0_i32_0, %c0_i32_1 : i32, i32, i32, i32
  }
}

</mosaic_0001>

<bundles_post_ra>
// kernel: tpu_custom_call.1
= control target key start
LH: loop header
LB: loop body
LE: loop exit
PB: predicated region body
PF: predicated region fallthrough
CT: control target
= control target key end

     0   :  { %9 = vsyncpa [#allocation4], 0  ;;  %s3563_s0 = inlined_call_operand.hbm [shape: f32[6,3,7,7], index: 0, kind: input, shape index: {}]   ;;  %s3564_s1 = inlined_call_operand.vmem [shape: f32[3], index: 1, kind: input, shape index: {}]   ;;  %s3565_s2 = inlined_call_operand.vmem [shape: f32[27], index: 2, kind: input, shape index: {}]   ;;  %s3566_s3 = inlined_call_operand.vmem [shape: f32[3], index: 3, kind: input, shape index: {}]   ;;  %s3567_s4 = inlined_call_operand.vmem [shape: f32[6,3,9,9], index: 4, kind: output, shape index: {}]  }
   0x1   :  { %10 = vsyncpa [#allocation5], 0 }
   0x2   :  { %11 = vsyncpa [#allocation8], 0  ;;  %s40_s17 = sshll.u32 %s3565_s2, 4  ;;  %s41_s17 = int_to_ptr.vmem [resolvable:$true] %s40_s17 }
   0x3   :  { %s1739_s18 = scalar_lea.vmem %s41_s17, 16  ;;  %p1744_p1 = scmp.lt.s32.totalorder %s41_s17, %s41_s17 }
   0x4   :  { %p1740_p0 = scmp.ne.s32.totalorder %s41_s17, %s1739_s18  ;;  %p1745_p2 = scmp.lt.s32.totalorder %s1739_s18, %s1739_s18 }
   0x6   :  { %p1746_p3 = por %p1745_p2, %p1744_p1 }
   0x8   :  { %p1747_p4 = pnand %p1746_p3, %p1740_p0 }
   0xa   :  { %1750 = shalt.err (!%p1747_p4)
}
   0xb   :  { %s1803_s19 = smov [#allocation7]   ;;  %s1804_s20 = smov [#allocation3]  }
   0xc   :  { %43 = dma.vmem_to_smem %s41_s17, 16, %s1803_s19, [#allocation8]  }
   0xd   :  { %s17_s21 = sshll.u32 %s1804_s20, 4  ;;  %s1751_s24 = scalar_lea.hbm %s3563_s0, 2304  ;;  %s18_s21 = int_to_ptr.vmem [resolvable:$true] %s17_s21 }
   0xe   :  { %p1752_p5 = scmp.ne.s32.totalorder %s3563_s0, %s1751_s24  ;;  %p1755_p6 = scmp.lt.u32.totalorder %s1751_s24, %s3563_s0 }
  0x10   :  { %p1757_p7 = pnand %p1755_p6, %p1752_p5 }
  0x12   :  { %1760 = shalt.err (!%p1757_p7)
}
  0x13   :  { %s1761_s28 = scalar_lea.vmem %s18_s21, 2304  ;;  %p1766_p9 = scmp.lt.s32.totalorder %s18_s21, %s18_s21 }
  0x14   :  { %p1762_p8 = scmp.ne.s32.totalorder %s18_s21, %s1761_s28  ;;  %p1767_p10 = scmp.lt.s32.totalorder %s1761_s28, %s1761_s28 }
  0x16   :  { %p1768_p11 = por %p1767_p10, %p1766_p9 }
  0x18   :  { %p1769_p12 = pnand %p1768_p11, %p1762_p8 }
  0x1a   :  { %1772 = shalt.err (!%p1769_p12)
}
  0x1b   :  { %s1805_s29 = smov 128   ;;  %s1806_s30 = smov 8  }
  0x1c   :  { %23 = dma.hbm_to_vmem [thread:$0]  %s3563_s0, 2304, %s18_s21, [#allocation4], %s1805_s29, %s1805_s29, %s1806_s30  }
  0x1d   :  { %s30_s9 = sshll.u32 %s3564_s1, 4  ;;  %s50_s12 = sshll.u32 %s3566_s3, 4  ;;  %s31_s9 = int_to_ptr.vmem [resolvable:$true] %s30_s9  ;;  %s51_s12 = int_to_ptr.vmem [resolvable:$true] %s50_s12 }
  0x1e   :  { %s1773_s13 = scalar_lea.vmem %s31_s9, 16  ;;  %p1778_p0 = scmp.lt.s32.totalorder %s31_s9, %s31_s9 }
  0x1f   :  { %p1774_p13 = scmp.ne.s32.totalorder %s31_s9, %s1773_s13  ;;  %p1779_p1 = scmp.lt.s32.totalorder %s1773_s13, %s1773_s13 }
  0x21   :  { %p1780_p2 = por %p1779_p1, %p1778_p0 }
  0x23   :  { %p1781_p3 = pnand %p1780_p2, %p1774_p13 }
  0x25   :  { %1784 = shalt.err (!%p1781_p3)
}
  0x26   :  { %s1807_s14 = smov [#allocation6]   ;;  %s1785_s0 = scalar_lea.vmem %s51_s12, 16 }
  0x27   :  { %33 = dma.vmem_to_smem %s31_s9, 16, %s1807_s14, [#allocation5]  }
  0x28   :  { %p1786_p4 = scmp.ne.s32.totalorder %s51_s12, %s1785_s0  ;;  %p1790_p5 = scmp.lt.s32.totalorder %s51_s12, %s51_s12 }
  0x29   :  { %p1791_p6 = scmp.lt.s32.totalorder %s1785_s0, %s1785_s0 }
  0x2b   :  { %p1792_p7 = por %p1791_p6, %p1790_p5 }
  0x2d   :  { %p1793_p8 = pnand %p1792_p7, %p1786_p4 }
  0x2f   :  { %1796 = shalt.err (!%p1793_p8)
}
  0x30   :  { %s1808_s1 = smov [#allocation9]  }
  0x31   :  { %53 = dma.vmem_to_smem %s51_s12, 16, %s1808_s1, [#allocation8]  }
  0x32   :  { %1797 = dma.done.wait [#allocation4], 2304  }
  0x33   :  { %1798 = vsyncadd [#allocation4], 4294964992 }
  0x34   :  { %1799 = dma.done.wait [#allocation5], 16  }
  0x35   :  { %1800 = vsyncadd [#allocation5], 4294967280 }
  0x36   :  { %1801 = dma.done.wait [#allocation8], 32  }
  0x37   :  { %1802 = vsyncadd [#allocation8], 4294967264 }
  0x38   :  { %66 = sfence }
  0x39   :  { %v3571_v0 = vmov 0.0   ;;  %s85_s3 = sld [smem:[#allocation6]]  ;;  %s1473_s15 = sld [smem:[#allocation6 + $0x1]]  ;;  %vm157_vm0 = vcmask 55296   ;;  %v70_v1 = vld [vmem:[#allocation3 + $0x18] sm:$0x7f] }
  0x3a   :  { %122 = vst [vmem:[#allocation2 + $0x8] sm:$0xff] %v3571_v0  ;;  %121 = vst [vmem:[#allocation2] sm:$0xff] %v3571_v0  ;;  %s1810_s16 = smov 1   ;;  %s1474_s17 = sld [smem:[#allocation6 + $0x2]]  ;;  %v71_v2 = vld [vmem:[#allocation3 + $0x20] sm:$0x7f] }
  0x3b   :  { %123 = vst [vmem:[#allocation2 + $0x10] sm:$0xff] %v3571_v0  ;;  %125 = vst [vmem:[#allocation2 + $0x20] sm:$0xff] %v3571_v0  ;;  %1537 = vrot.lane.b32.xlu0 %v3571_v0, %s1810_s16  ;;  %1547 = vrot.lane.b32.xlu1 %v3571_v0, %s1810_s16  ;;  %v72_v3 = vld [vmem:[#allocation3 + $0x28] sm:$0x7f]  ;;  %v67_v4 = vld [vmem:[#allocation3] sm:$0x7f] }
  0x3c   :  { %127 = vst [vmem:[#allocation2 + $0x30] sm:$0xff] %v3571_v0  ;;  %129 = vst [vmem:[#allocation2 + $0x40] sm:$0xff] %v3571_v0  ;;  %v68_v5 = vld [vmem:[#allocation3 + $0x8] sm:$0x7f]  ;;  %v69_v6 = vld [vmem:[#allocation3 + $0x10] sm:$0x7f] }
  0x3d   :  { %131 = vst [vmem:[#allocation2 + $0x50] sm:$0xff] %v3571_v0  ;;  %133 = vst [vmem:[#allocation2 + $0x60] sm:$0xff] %v3571_v0  ;;  %v73_v9 = vld [vmem:[#allocation3 + $0x30] sm:$0x7f]  ;;  %v74_v10 = vld [vmem:[#allocation3 + $0x38] sm:$0x7f] }
  0x3e   :  { %135 = vst [vmem:[#allocation2 + $0x70] sm:$0xff] %v3571_v0  ;;  %137 = vst [vmem:[#allocation2 + $0x80] sm:$0xff] %v3571_v0  ;;  %v75_v11 = vld [vmem:[#allocation3 + $0x40] sm:$0x7f]  ;;  %v80_v16 = vld [vmem:[#allocation3 + $0x68] sm:$0x7f] }
  0x3f   :  { %139 = vst [vmem:[#allocation2 + $0x90] sm:$0xff] %v3571_v0  ;;  %141 = vst [vmem:[#allocation2 + $0xa0] sm:$0xff] %v3571_v0  ;;  %1542 = vrot.lane.b32.xlu0 %v3571_v0, %s1810_s16  ;;  %v86_v7 = vstv %s85_s3  ;;  %v94_v8 = vstv %s1473_s15  ;;  %v79_v15 = vld [vmem:[#allocation3 + $0x60] sm:$0x7f]  ;;  %v81_v17 = vld [vmem:[#allocation3 + $0x70] sm:$0x7f] }
  0x40   :  { %143 = vst [vmem:[#allocation2 + $0xb0] sm:$0xff] %v3571_v0  ;;  %145 = vst [vmem:[#allocation2 + $0xc0] sm:$0xff] %v3571_v0  ;;  %v88_v12 = vmul.f32 %v86_v7, %v70_v1  ;;  %v96_v13 = vmul.f32 %v94_v8, %v71_v2  ;;  %v108_v14 = vstv %s1474_s17  ;;  %v87_v19 = vmul.f32 %v86_v7, %v67_v4  ;;  %v76_v22 = vld [vmem:[#allocation3 + $0x48] sm:$0x7f]  ;;  %v77_v23 = vld [vmem:[#allocation3 + $0x50] sm:$0x7f] }
  0x41   :  { %146 = vst [vmem:[#allocation2 + $0xc8] sm:$0xff] %v3571_v0  ;;  %147 = vst [vmem:[#allocation2 + $0xd0] sm:$0xff] %v3571_v0  ;;  %v110_v18 = vmul.f32 %v108_v14, %v72_v3  ;;  %v95_v20 = vmul.f32 %v94_v8, %v68_v5  ;;  %v109_v21 = vmul.f32 %v108_v14, %v69_v6  ;;  %s1811_s18 = smov 2   ;;  %v78_v28 = vld [vmem:[#allocation3 + $0x58] sm:$0x7f]  ;;  %s178_s19 = sld [smem:[#allocation7]] }
  0x42   :  { %148 = vst [vmem:[#allocation2 + $0xd8] sm:$0xff] %v3571_v0  ;;  %149 = vst [vmem:[#allocation2 + $0xe0] sm:$0xff] %v3571_v0  ;;  %v102_v24 = vadd.f32 %v96_v13, %v88_v12  ;;  %v89_v25 = vmul.f32 %v86_v7, %v73_v9  ;;  %v97_v26 = vmul.f32 %v94_v8, %v74_v10  ;;  %v82_v29 = vld [vmem:[#allocation3 + $0x78] sm:$0x7f]  ;;  %v83_v34 = vld [vmem:[#allocation3 + $0x80] sm:$0x7f] }
  0x43   :  { %150 = vst [vmem:[#allocation2 + $0xe8] sm:$0xff] %v3571_v0  ;;  %151 = vst [vmem:[#allocation2 + $0xf0] sm:$0xff] %v3571_v0  ;;  %1552 = vrot.lane.b32.xlu0 %v3571_v0, %s1811_s18  ;;  %v111_v27 = vmul.f32 %v108_v14, %v75_v11  ;;  %v101_v30 = vadd.f32 %v95_v20, %v87_v19  ;;  %v91_v31 = vmul.f32 %v86_v7, %v79_v15  ;;  %v84_v35 = vld [vmem:[#allocation3 + $0x88] sm:$0x7f]  ;;  %s205_s20 = sld [smem:[#allocation9]]  ;;  %s1477_s21 = sld [smem:[#allocation7 + $0x3]] }
  0x44   :  { %152 = vst [vmem:[#allocation2 + $0xf8] sm:$0xff] %v3571_v0  ;;  %153 = vst [vmem:[#allocation2 + $0x100] sm:$0xff] %v3571_v0  ;;  %v99_v32 = vmul.f32 %v94_v8, %v80_v16  ;;  %v113_v33 = vmul.f32 %v108_v14, %v81_v17  ;;  %v116_v36 = vadd.f32 %v110_v18, %v102_v24  ;;  %s1480_s22 = sld [smem:[#allocation7 + $0x6]]  ;;  %s1475_s23 = sld [smem:[#allocation7 + $0x1]]  ;;  %vm612_vm1 = vcmask 72704  }
  0x45   :  { %154 = vst [vmem:[#allocation2 + $0x108] sm:$0xff] %v3571_v0  ;;  %155 = vst [vmem:[#allocation2 + $0x110] sm:$0xff] %v3571_v0  ;;  %v103_v37 = vadd.f32 %v97_v26, %v89_v25  ;;  %v90_v38 = vmul.f32 %v86_v7, %v76_v22  ;;  %v98_v39 = vmul.f32 %v94_v8, %v77_v23  ;;  %s1476_s24 = sld [smem:[#allocation7 + $0x2]]  ;;  %s2240_s25 = sld [smem:[#allocation7 + $0x4]]  ;;  %vm614_vm2 = vcmask 65536  }
  0x46   :  { %156 = vst [vmem:[#allocation2 + $0x118] sm:$0xff] %v3571_v0  ;;  %v115_v40 = vadd.f32 %v109_v21, %v101_v30  ;;  %v105_v41 = vadd.f32 %v99_v32, %v91_v31  ;;  %v112_v42 = vmul.f32 %v108_v14, %v78_v28  ;;  %v92_v43 = vmul.f32 %v86_v7, %v82_v29  ;;  %s2250_s26 = sld [smem:[#allocation7 + $0x5]]  ;;  %s2266_s2 = sld [smem:[#allocation7 + $0x7]] }
  0x47   :  { %159 = vst.msk [vmem:[#allocation2 + $0x10] sm:$0x7f] %vm157_vm0, %v116_v36  ;;  %166 = vst.msk [vmem:[#allocation2 + $0x71] sm:$0x7f] %vm157_vm0, %v116_v36  ;;  %v117_v44 = vadd.f32 %v111_v27, %v103_v37  ;;  %v104_v45 = vadd.f32 %v98_v39, %v90_v38  ;;  %v100_v46 = vmul.f32 %v94_v8, %v83_v34  ;;  %v219_v39 = vstv %s178_s19  ;;  %s2268_s27 = sld [smem:[#allocation7 + $0x8]]  ;;  %s2750_s28 = sld [smem:[#allocation7 + $0xa]] }
  0x48   :  { %173 = vst.msk [vmem:[#allocation2 + $0xd2] sm:$0x7f] %vm157_vm0, %v116_v36  ;;  %v114_v47 = vmul.f32 %v108_v14, %v84_v35  ;;  %158 = vst.msk [vmem:[#allocation2] sm:$0x7f] %vm157_vm0, %v115_v40  ;;  %v119_v48 = vadd.f32 %v113_v33, %v105_v41  ;;  %s2782_s29 = sld [smem:[#allocation7 + $0xb]]  ;;  %s2797_s30 = sld [smem:[#allocation7 + $0xd]] }
  0x49   :  { %165 = vst.msk [vmem:[#allocation2 + $0x61] sm:$0x7f] %vm157_vm0, %v115_v40  ;;  %172 = vst.msk [vmem:[#allocation2 + $0xc2] sm:$0x7f] %vm157_vm0, %v115_v40  ;;  %v118_v49 = vadd.f32 %v112_v42, %v104_v45  ;;  %v106_v50 = vadd.f32 %v100_v46, %v92_v43  ;;  %v223_v42 = vmul.f32 0.0, %v219_v39  ;;  %v2177_v43 = vstv %s205_s20  ;;  %s2799_s5 = sld [smem:[#allocation7 + $0xe]] }
  0x4a   :  { %160 = vst.msk [vmem:[#allocation2 + $0x20] sm:$0x7f] %vm157_vm0, %v117_v44  ;;  %167 = vst.msk [vmem:[#allocation2 + $0x81] sm:$0x7f] %vm157_vm0, %v117_v44  ;;  %v354_v45 = vstv %s1477_s21  ;;  %s2816_s6 = sld [smem:[#allocation7 + $0x10]]  ;;  %s2818_s7 = sld [smem:[#allocation7 + $0x11]] }
  0x4b   :  { %174 = vst.msk [vmem:[#allocation2 + $0xe2] sm:$0x7f] %vm157_vm0, %v117_v44  ;;  %162 = vst.msk [vmem:[#allocation2 + $0x40] sm:$0x7f] %vm157_vm0, %v119_v48  ;;  %v120_v51 = vadd.f32 %v114_v47, %v106_v50  ;;  %s1496_s8 = sld [smem:[#allocation7 + $0x16]]  ;;  %s3304_s9 = sld [smem:[#allocation7 + $0x17]] }
  0x4c   :  { %169 = vst.msk [vmem:[#allocation2 + $0xa1] sm:$0x7f] %vm157_vm0, %v119_v48  ;;  %176 = vst.msk [vmem:[#allocation2 + $0x102] sm:$0x7f] %vm157_vm0, %v119_v48  ;;  %v2187_v48 = vadd.f32 %v223_v42, %v2177_v43  ;;  %s3311_s10 = sld [smem:[#allocation7 + $0x19]]  ;;  %s3322_s11 = sld [smem:[#allocation7 + $0x1a]] }
  0x4d   :  { %161 = vst.msk [vmem:[#allocation2 + $0x30] sm:$0x7f] %vm157_vm0, %v118_v49  ;;  %168 = vst.msk [vmem:[#allocation2 + $0x91] sm:$0x7f] %vm157_vm0, %v118_v49 }
  0x4e   :  { %175 = vst.msk [vmem:[#allocation2 + $0xf2] sm:$0x7f] %vm157_vm0, %v118_v49  ;;  %163 = vst.msk [vmem:[#allocation2 + $0x50] sm:$0x7f] %vm157_vm0, %v120_v51  ;;  %v1909_v52 = vld [vmem:[#allocation2 + $0x10] sm:$0xff]  ;;  %v2189_v49 = vstv %s1480_s22 }
  0x4f   :  { %170 = vst.msk [vmem:[#allocation2 + $0xb1] sm:$0x7f] %vm157_vm0, %v120_v51  ;;  %177 = vst.msk [vmem:[#allocation2 + $0x112] sm:$0x7f] %vm157_vm0, %v120_v51  ;;  %248 = vrot.lane.b32.xlu1 %v1909_v52, %s1810_s16  ;;  %v1913_v53 = vld [vmem:[#allocation2] sm:$0xff]  ;;  %v1951_v59 = vld [vmem:[#allocation2 + $0x70] sm:$0xff]  ;;  %v222_v47 = vmul.f32 %v219_v39, %v1909_v52 }
  0x50   :  { %244 = vrot.lane.b32.xlu0 %v1913_v53, %s1810_s16  ;;  %v1945_v58 = vld [vmem:[#allocation2 + $0x60] sm:$0xff]  ;;  %v1999_v2 = vld [vmem:[#allocation2 + $0xd0] sm:$0xff]  ;;  %v2005_v3 = vld [vmem:[#allocation2 + $0xc8] sm:$0xff]  ;;  %3620 = vst [vmem:[#allocation25_spill] sm:$0xff] %v2189_v49  ;;  %v220_v50 = vmul.f32 %v219_v39, %v1913_v53  ;;  %v2194_v51 = vmul.f32 0.0, %v354_v45 }
  0x51   :  { %v1917_v54 = vld [vmem:[#allocation2 + $0x20] sm:$0xff]  ;;  %v2013_v5 = vld [vmem:[#allocation2 + $0xd8] sm:$0xff]  ;;  %v2204_v42 = vmul.f32 %v354_v45, %v1945_v58 }
  0x52   :  { %v1919_v55 = vld [vmem:[#allocation2 + $0x40] sm:$0xff]  ;;  %v2021_v7 = vld [vmem:[#allocation2 + $0xe8] sm:$0xff] }
  0x53   :  { %252 = vrot.lane.b32.xlu1 %v1917_v54, %s1810_s16  ;;  %v1961_v60 = vld [vmem:[#allocation2 + $0x80] sm:$0xff]  ;;  %v2037_v11 = vld [vmem:[#allocation2 + $0x108] sm:$0xff] }
  0x54   :  { %260 = vrot.lane.b32.xlu0 %v1919_v55, %s1810_s16  ;;  %v1925_v56 = vld [vmem:[#allocation2 + $0x30] sm:$0xff]  ;;  %v1963_v61 = vld [vmem:[#allocation2 + $0xa0] sm:$0xff]  ;;  %3610 = vst [vmem:[#allocation15_spill] sm:$0xff] %v2037_v11 }
  0x55   :  { %v1927_v57 = vld [vmem:[#allocation2 + $0x50] sm:$0xff]  ;;  %v1993_v1 = vld [vmem:[#allocation2 + $0xc0] sm:$0xff]  ;;  %v2029_v9 = vld [vmem:[#allocation2 + $0xf8] sm:$0xff] }
  0x56   :  { %v1969_v62 = vld [vmem:[#allocation2 + $0x90] sm:$0xff]  ;;  %v2007_v4 = vld [vmem:[#allocation2 + $0xe0] sm:$0xff]  ;;  %3608 = vst [vmem:[#allocation13_spill] sm:$0xff] %v2029_v9  ;;  %v2043_v12 = vld [vmem:[#allocation2 + $0x118] sm:$0xff] }
  0x57   :  { %256 = vrot.lane.b32.xlu1 %v1925_v56, %s1810_s16  ;;  %v1971_v63 = vld [vmem:[#allocation2 + $0xb0] sm:$0xff]  ;;  %v2023_v8 = vld [vmem:[#allocation2 + $0x100] sm:$0xff]  ;;  %3611 = vst [vmem:[#allocation16_spill] sm:$0xff] %v2043_v12 }
  0x58   :  { %264 = vrot.lane.b32.xlu0 %v1927_v57, %s1810_s16  ;;  %v2015_v6 = vld [vmem:[#allocation2 + $0xf0] sm:$0xff] }
  0x59   :  { %v2031_v10 = vld [vmem:[#allocation2 + $0x110] sm:$0xff] }
  0x5a   :  { %3609 = vst [vmem:[#allocation14_spill] sm:$0xff] %v2031_v10 }
  0x5b   :  { %293 = vrot.lane.b32.xlu1 %v1913_v53, %s1811_s18 }
  0x5c   :  { %301 = vrot.lane.b32.xlu0 %v1917_v54, %s1811_s18 }
  0x5f   :  { %297 = vrot.lane.b32.xlu1 %v1909_v52, %s1811_s18 }
  0x60   :  { %305 = vrot.lane.b32.xlu0 %v1925_v56, %s1811_s18 }
  0x63   :  { %1557 = vrot.lane.b32.xlu1 %v3571_v0, %s1811_s18 }
  0x64   :  { %1562 = vrot.lane.b32.xlu0 %v3571_v0, %s1811_s18 }
  0x67   :  { %309 = vrot.lane.b32.xlu1 %v1919_v55, %s1811_s18 }
  0x68   :  { %379 = vrot.lane.b32.xlu0 %v1945_v58, %s1810_s16 }
  0x6b   :  { %313 = vrot.lane.b32.xlu1 %v1927_v57, %s1811_s18 }
  0x6c   :  { %383 = vrot.lane.b32.xlu0 %v1951_v59, %s1810_s16 }
  0x6f   :  { %1567 = vrot.lane.b32.xlu1 %v3571_v0, %s1810_s16 }
  0x70   :  { %1572 = vrot.lane.b32.xlu0 %v3571_v0, %s1810_s16 }
  0x73   :  { %387 = vrot.lane.b32.xlu1 %v1961_v60, %s1810_s16 }
  0x74   :  { %395 = vrot.lane.b32.xlu0 %v1963_v61, %s1810_s16 }
  0x77   :  { %391 = vrot.lane.b32.xlu1 %v1969_v62, %s1810_s16 }
  0x78   :  { %399 = vrot.lane.b32.xlu0 %v1971_v63, %s1810_s16 }
  0x7b   :  { %1577 = vrot.lane.b32.xlu1 %v3571_v0, %s1810_s16 }
  0x7c   :  { %1582 = vrot.lane.b32.xlu0 %v3571_v0, %s1811_s18 }
  0x7f   :  { %428 = vrot.lane.b32.xlu1 %v1945_v58, %s1811_s18 }
  0x80   :  { %436 = vrot.lane.b32.xlu0 %v1961_v60, %s1811_s18 }
  0x83   :  { %432 = vrot.lane.b32.xlu1 %v1951_v59, %s1811_s18 }
  0x84   :  { %440 = vrot.lane.b32.xlu0 %v1969_v62, %s1811_s18 }
  0x87   :  { %1587 = vrot.lane.b32.xlu1 %v3571_v0, %s1811_s18 }
  0x88   :  { %1592 = vrot.lane.b32.xlu0 %v3571_v0, %s1811_s18 }
  0x8b   :  { %444 = vrot.lane.b32.xlu1 %v1963_v61, %s1811_s18 }
  0x8c   :  { %514 = vrot.lane.b32.xlu0 %v1993_v1, %s1810_s16 }
  0x8f   :  { %448 = vrot.lane.b32.xlu1 %v1971_v63, %s1811_s18 }
  0x90   :  { %518 = vrot.lane.b32.xlu0 %v1999_v2, %s1810_s16 }
  0x93   :  { %516 = vrot.lane.b32.xlu1 %v2005_v3, %s1810_s16 }
  0x94   :  { %522 = vrot.lane.b32.xlu0 %v2007_v4, %s1810_s16 }
  0x97   :  { %520 = vrot.lane.b32.xlu1 %v2013_v5, %s1810_s16 }
  0x98   :  { %526 = vrot.lane.b32.xlu0 %v2015_v6, %s1810_s16 }
  0x9b   :  { %524 = vrot.lane.b32.xlu1 %v2021_v7, %s1810_s16 }
  0x9c   :  { %530 = vrot.lane.b32.xlu0 %v2023_v8, %s1810_s16 }
  0x9f   :  { %528 = vrot.lane.b32.xlu1 %v2029_v9, %s1810_s16 }
  0xa0   :  { %534 = vrot.lane.b32.xlu0 %v2031_v10, %s1810_s16 }
  0xa3   :  { %532 = vrot.lane.b32.xlu1 %v2037_v11, %s1810_s16 }
  0xa4   :  { %563 = vrot.lane.b32.xlu0 %v1993_v1, %s1811_s18 }
  0xa7   :  { %536 = vrot.lane.b32.xlu1 %v2043_v12, %s1810_s16 }
  0xa8   :  { %567 = vrot.lane.b32.xlu0 %v1999_v2, %s1811_s18 }
  0xab   :  { %565 = vrot.lane.b32.xlu1 %v2005_v3, %s1811_s18 }
  0xac   :  { %571 = vrot.lane.b32.xlu0 %v2007_v4, %s1811_s18 }
  0xad   :  { %v2057_v13 = vpop.permute.xlu0 %1537  ;;  %v2071_v15 = vpop.permute.xlu1 %1547 }
  0xaf   :  { %569 = vrot.lane.b32.xlu1 %v2013_v5, %s1811_s18 }
  0xb0   :  { %575 = vrot.lane.b32.xlu0 %v2015_v6, %s1811_s18 }
  0xb1   :  { %v2063_v14 = vpop.permute.xlu0 %1542 }
  0xb3   :  { %573 = vrot.lane.b32.xlu1 %v2021_v7, %s1811_s18 }
  0xb4   :  { %579 = vrot.lane.b32.xlu0 %v2023_v8, %s1811_s18 }
  0xb5   :  { %v2075_v16 = vpop.permute.xlu0 %1552 }
  0xb7   :  { %577 = vrot.lane.b32.xlu1 %v2029_v9, %s1811_s18 }
  0xb8   :  { %583 = vrot.lane.b32.xlu0 %v2031_v10, %s1811_s18 }
  0xbb   :  { %581 = vrot.lane.b32.xlu1 %v2037_v11, %s1811_s18 }
  0xbc   :  { %665 = vrot.lane.b32.xlu0 %v1913_v53, %s1810_s16 }
  0xbf   :  { %585 = vrot.lane.b32.xlu1 %v2043_v12, %s1811_s18  ;;  %v2196_v12 = vstv %s1475_s23 }
  0xc0   :  { %669 = vrot.lane.b32.xlu0 %v1909_v52, %s1810_s16 }
  0xc1   :  { %v2081_v17 = vpop.permute.xlu1 %248 }
  0xc2   :  { %v2083_v18 = vpop.permute.xlu0 %244 }
  0xc3   :  { %1597 = vrot.lane.b32.xlu1 %v3571_v0, %s1810_s16 }
  0xc4   :  { %1602 = vrot.lane.b32.xlu0 %v3571_v0, %s1810_s16 }
  0xc5   :  { %v2089_v19 = vpop.permute.xlu1 %252 }
  0xc6   :  { %v2091_v20 = vpop.permute.xlu0 %260 }
  0xc7   :  { %673 = vrot.lane.b32.xlu1 %v1917_v54, %s1810_s16 }
  0xc8   :  { %681 = vrot.lane.b32.xlu0 %v1919_v55, %s1810_s16 }
  0xc9   :  { %v2097_v21 = vpop.permute.xlu1 %256 }
  0xca   :  { %v2099_v22 = vpop.permute.xlu0 %264 }
  0xcb   :  { %677 = vrot.lane.b32.xlu1 %v1925_v56, %s1810_s16 }
  0xcc   :  { %685 = vrot.lane.b32.xlu0 %v1927_v57, %s1810_s16 }
  0xcd   :  { %v2105_v23 = vpop.permute.xlu1 %293 }
  0xce   :  { %v2107_v24 = vpop.permute.xlu0 %301 }
  0xcf   :  { %1607 = vrot.lane.b32.xlu1 %v3571_v0, %s1810_s16 }
  0xd0   :  { %1612 = vrot.lane.b32.xlu0 %v3571_v0, %s1811_s18 }
  0xd1   :  { %v2113_v25 = vpop.permute.xlu1 %297 }
  0xd2   :  { %v2115_v26 = vpop.permute.xlu0 %305 }
  0xd3   :  { %714 = vrot.lane.b32.xlu1 %v1913_v53, %s1811_s18 }
  0xd4   :  { %722 = vrot.lane.b32.xlu0 %v1917_v54, %s1811_s18 }
  0xd5   :  { %v2121_v27 = vpop.permute.xlu1 %1557 }
  0xd6   :  { %v2123_v28 = vpop.permute.xlu0 %1562 }
  0xd7   :  { %718 = vrot.lane.b32.xlu1 %v1909_v52, %s1811_s18 }
  0xd8   :  { %726 = vrot.lane.b32.xlu0 %v1925_v56, %s1811_s18 }
  0xd9   :  { %v2129_v29 = vpop.permute.xlu1 %309 }
  0xda   :  { %v2131_v30 = vpop.permute.xlu0 %379 }
  0xdb   :  { %1617 = vrot.lane.b32.xlu1 %v3571_v0, %s1811_s18 }
  0xdc   :  { %1622 = vrot.lane.b32.xlu0 %v3571_v0, %s1811_s18 }
  0xdd   :  { %v2137_v31 = vpop.permute.xlu1 %313 }
  0xde   :  { %v2139_v32 = vpop.permute.xlu0 %383 }
  0xdf   :  { %730 = vrot.lane.b32.xlu1 %v1919_v55, %s1811_s18 }
  0xe0   :  { %800 = vrot.lane.b32.xlu0 %v1945_v58, %s1810_s16 }
  0xe1   :  { %v2145_v33 = vpop.permute.xlu1 %1567 }
  0xe2   :  { %v2147_v34 = vpop.permute.xlu0 %1572 }
  0xe3   :  { %3612 = vst [vmem:[#allocation17_spill] sm:$0xff] %v2147_v34  ;;  %734 = vrot.lane.b32.xlu1 %v1927_v57, %s1811_s18 }
  0xe4   :  { %804 = vrot.lane.b32.xlu0 %v1951_v59, %s1810_s16 }
  0xe5   :  { %v2153_v35 = vpop.permute.xlu1 %387 }
  0xe6   :  { %3613 = vst [vmem:[#allocation18_spill] sm:$0xff] %v2153_v35  ;;  %v2155_v36 = vpop.permute.xlu0 %395  ;;  %v2227_v35 = vadd.f32 %v222_v47, %v2177_v43  ;;  %v226_v47 = vmul.f32 %v219_v39, %v1925_v56  ;;  %v1550_v56 = vunpack.i.h.bf16 %v2071_v15 }
  0xe7   :  { %3614 = vst [vmem:[#allocation19_spill] sm:$0xff] %v2155_v36  ;;  %1627 = vrot.lane.b32.xlu1 %v3571_v0, %s1810_s16  ;;  %v2216_v36 = vmul.f32 %v354_v45, %v1961_v60 }
  0xe8   :  { %1632 = vrot.lane.b32.xlu0 %v3571_v0, %s1810_s16 }
  0xe9   :  { %v2161_v37 = vpop.permute.xlu1 %391 }
  0xea   :  { %3615 = vst [vmem:[#allocation20_spill] sm:$0xff] %v2161_v37  ;;  %v2163_v38 = vpop.permute.xlu0 %399  ;;  %v2207_v37 = vmul.f32 %v354_v45, %v1951_v59 }
  0xeb   :  { %3616 = vst [vmem:[#allocation21_spill] sm:$0xff] %v2163_v38  ;;  %808 = vrot.lane.b32.xlu1 %v1961_v60, %s1810_s16  ;;  %v224_v38 = vmul.f32 %v219_v39, %v1917_v54  ;;  %v2224_v54 = vmul.f32 %v2189_v49, %v2005_v3 }
  0xec   :  { %816 = vrot.lane.b32.xlu0 %v1963_v61, %s1810_s16 }
  0xed   :  { %v2169_v40 = vpop.permute.xlu1 %1577  ;;  %3625 = vst [vmem:[#allocation30_spill] sm:$0xff] %v2224_v54  ;;  %v232_v54 = vadd.f32 %v220_v50, %v2177_v43  ;;  %v1545_v50 = vunpack.i.h.bf16 %v2063_v14 }
  0xee   :  { %3617 = vst [vmem:[#allocation22_spill] sm:$0xff] %v2169_v40  ;;  %v2171_v41 = vpop.permute.xlu0 %1582  ;;  %v2198_v40 = vstv %s1476_s24 }
  0xef   :  { %3618 = vst [vmem:[#allocation23_spill] sm:$0xff] %v2171_v41  ;;  %812 = vrot.lane.b32.xlu1 %v1969_v62, %s1810_s16  ;;  %v236_v41 = vadd.f32 %v224_v38, %v2177_v43  ;;  %v2281_v38 = vmul.f32 %v2189_v49, %v2023_v8 }
  0xf0   :  { %820 = vrot.lane.b32.xlu0 %v1971_v63, %s1810_s16 }
  0xf1   :  { %v2179_v44 = vpop.permute.xlu1 %428  ;;  %3633 = vst [vmem:[#allocation38_spill] sm:$0xff] %v2281_v38 }
  0xf2   :  { %v2181_v46 = vpop.permute.xlu0 %436 }
  0xf3   :  { %3619 = vst [vmem:[#allocation24_spill] sm:$0xff] %v2181_v46  ;;  %1637 = vrot.lane.b32.xlu1 %v3571_v0, %s1810_s16  ;;  %v2220_v46 = vmul.f32 %v2189_v49, %v1993_v1 }
  0xf4   :  { %1642 = vrot.lane.b32.xlu0 %v3571_v0, %s1811_s18  ;;  %v2211_v0 = vmul.f32 %v2189_v49, %v1999_v2 }
  0xf5   :  { %v2200_v52 = vpop.permute.xlu1 %432  ;;  %3624 = vst [vmem:[#allocation29_spill] sm:$0xff] %v2220_v46  ;;  %v1539_v46 = vunpack.i.l.bf16 %v2057_v13 }
  0xf6   :  { %3621 = vst [vmem:[#allocation26_spill] sm:$0xff] %v2200_v52  ;;  %3622 = vst [vmem:[#allocation27_spill] sm:$0xff] %v2211_v0  ;;  %v2213_v53 = vpop.permute.xlu0 %440  ;;  %v228_v0 = vmul.f32 %v219_v39, %v1919_v55  ;;  %v2237_v52 = vmul.f32 %v2189_v49, %v2007_v4  ;;  %v1540_v55 = vunpack.i.h.bf16 %v2057_v13  ;;  %v2272_v13 = vmul.f32 %v2189_v49, %v2021_v7 }
  0xf7   :  { %3623 = vst [vmem:[#allocation28_spill] sm:$0xff] %v2213_v53  ;;  %849 = vrot.lane.b32.xlu1 %v1945_v58, %s1811_s18  ;;  %v2233_v53 = vmul.f32 %v354_v45, %v1963_v61  ;;  %v2246_v58 = vmul.f32 %v354_v45, %v1969_v62 }
  0xf8   :  { %3627 = vst [vmem:[#allocation32_spill] sm:$0xff] %v2237_v52  ;;  %857 = vrot.lane.b32.xlu0 %v1961_v60, %s1811_s18  ;;  %v2256_v52 = vmul.f32 %v2189_v49, %v2013_v5  ;;  %v2260_v60 = vmul.f32 %v2189_v49, %v2015_v6  ;;  %3632 = vst [vmem:[#allocation37_spill] sm:$0xff] %v2272_v13  ;;  %v2288_v13 = vmul.f32 %v354_v45, %v1971_v63 }
  0xf9   :  { %3626 = vst [vmem:[#allocation31_spill] sm:$0xff] %v2233_v53  ;;  %v2252_v53 = vpop.permute.xlu1 %1587  ;;  %v280_v45 = vmul.f32 %v1550_v56, %v2196_v12 }
  0xfa   :  { %3628 = vst [vmem:[#allocation33_spill] sm:$0xff] %v2252_v53  ;;  %3629 = vst [vmem:[#allocation34_spill] sm:$0xff] %v2256_v52  ;;  %v2264_v34 = vpop.permute.xlu0 %1592  ;;  %v1549_v52 = vunpack.i.l.bf16 %v2071_v15  ;;  %v1554_v53 = vunpack.i.l.bf16 %v2075_v16  ;;  %v2292_v15 = vmul.f32 %v2189_v49, %v2029_v9  ;;  %v318_v9 = vmul.f32 %v2198_v40, %v2105_v23 }
  0xfb   :  { %3630 = vst [vmem:[#allocation35_spill] sm:$0xff] %v2260_v60  ;;  %3631 = vst [vmem:[#allocation36_spill] sm:$0xff] %v2264_v34  ;;  %853 = vrot.lane.b32.xlu1 %v1951_v59, %s1811_s18  ;;  %v230_v60 = vmul.f32 %v219_v39, %v1927_v57  ;;  %v270_v34 = vmul.f32 %v1539_v46, %v2196_v12  ;;  %v272_v57 = vmul.f32 %v1540_v55, %v2196_v12 }
  0xfc   :  { %861 = vrot.lane.b32.xlu0 %v1969_v62, %s1811_s18  ;;  %3634 = vst [vmem:[#allocation39_spill] sm:$0xff] %v2292_v15  ;;  %v1555_v59 = vunpack.i.h.bf16 %v2075_v16  ;;  %v2300_v46 = vmul.f32 %v2189_v49, %v2031_v10  ;;  %v2304_v62 = vmul.f32 %v2189_v49, %v2037_v11  ;;  %v240_v15 = vadd.f32 %v228_v0, %v2177_v43 }
  0xfd   :  { %v2296_v39 = vpop.permute.xlu1 %444  ;;  %v276_v55 = vmul.f32 %v1545_v50, %v2196_v12  ;;  %v1544_v16 = vunpack.i.l.bf16 %v2063_v14  ;;  %v3638_v10 = vmov 0.0   ;;  %v282_v56 = vadd.f32 %v270_v34, %v2187_v48 }
  0xfe   :  { %3635 = vst [vmem:[#allocation40_spill] sm:$0xff] %v2296_v39  ;;  %3636 = vst [vmem:[#allocation41_spill] sm:$0xff] %v2300_v46  ;;  %v2308_v38 = vpop.permute.xlu0 %514  ;;  %v278_v39 = vmul.f32 %v1549_v52, %v2196_v12  ;;  %v238_v46 = vadd.f32 %v226_v47, %v2177_v43  ;;  %v242_v0 = vadd.f32 %v230_v60, %v2177_v43  ;;  %v2320_v49 = vstv %s2240_s25  ;;  %s1483_s25 = sld [smem:[#allocation7 + $0x9]] }
  0xff   :  { %3637 = vst [vmem:[#allocation42_spill] sm:$0xff] %v2304_v62  ;;  %1647 = vrot.lane.b32.xlu1 %v3638_v10, %s1811_s18  ;;  %v319_v62 = vmul.f32 %v1554_v53, %v2198_v40  ;;  %v284_v14 = vadd.f32 %v272_v57, %v2187_v48  ;;  %v321_v52 = vmul.f32 %v1555_v59, %v2198_v40  ;;  %v2329_v50 = vstv %s2250_s26  ;;  %s1486_s26 = sld [smem:[#allocation7 + $0xc]] }
 0x100   :  { %1652 = vrot.lane.b32.xlu0 %v3638_v10, %s1811_s18  ;;  %v269_v47 = vmul.f32 %v2196_v12, %v2083_v18  ;;  %v2334_v34 = vadd.f32 %v280_v45, %v2187_v48  ;;  %v273_v43 = vmul.f32 %v2196_v12, %v2089_v19  ;;  %v2339_v53 = vstv %s2266_s2  ;;  %s1489_s2 = sld [smem:[#allocation7 + $0xf]] }
 0x101   :  { %v2331_v11 = vpop.permute.xlu1 %448  ;;  %v2344_v57 = vstv %s2268_s27  ;;  %v288_v59 = vadd.f32 %v276_v55, %v2187_v48  ;;  %v274_v18 = vmul.f32 %v1544_v16, %v2196_v12  ;;  %v290_v10 = vadd.f32 %v278_v39, %v2187_v48  ;;  %s2744_s27 = sld [smem:[#allocation9 + $0x1]] }
 0x102   :  { %3639 = vst [vmem:[#allocation43_spill] sm:$0xff] %v2331_v11  ;;  %v2341_v60 = vpop.permute.xlu0 %518  ;;  %3640 = vst [vmem:[#allocation44_spill] sm:$0xff] %v2344_v57  ;;  %v271_v11 = vmul.f32 %v2196_v12, %v2081_v17  ;;  %v331_v45 = vadd.f32 %v319_v62, %v282_v56  ;;  %v275_v19 = vmul.f32 %v2196_v12, %v2097_v21  ;;  %v1560_v23 = vunpack.i.h.bf16 %v2121_v27 }
 0x103   :  { %865 = vrot.lane.b32.xlu1 %v1963_v61, %s1811_s18  ;;  %v322_v55 = vmul.f32 %v2198_v40, %v2107_v24  ;;  %v333_v39 = vadd.f32 %v321_v52, %v284_v14  ;;  %v281_v16 = vadd.f32 %v269_v47, %v232_v54  ;;  %v320_v17 = vmul.f32 %v2198_v40, %v2113_v25 }
 0x104   :  { %935 = vrot.lane.b32.xlu0 %v1993_v1, %s1810_s16  ;;  %v1559_v61 = vunpack.i.l.bf16 %v2121_v27  ;;  %v285_v56 = vadd.f32 %v273_v43, %v236_v41  ;;  %v324_v21 = vmul.f32 %v2198_v40, %v2115_v26  ;;  %v1564_v24 = vunpack.i.l.bf16 %v2123_v28 }
 0x105   :  { %v2364_v62 = vpop.permute.xlu1 %516  ;;  %v286_v14 = vadd.f32 %v274_v18, %v2187_v48  ;;  %v283_v54 = vadd.f32 %v271_v11, %v2227_v35  ;;  %v277_v25 = vmul.f32 %v2196_v12, %v2091_v20  ;;  %v1565_v52 = vunpack.i.h.bf16 %v2123_v28 }
 0x106   :  { %v2370_v57 = vpop.permute.xlu0 %522  ;;  %v287_v41 = vadd.f32 %v275_v19, %v238_v46  ;;  %v279_v26 = vmul.f32 %v2196_v12, %v2099_v22  ;;  %v330_v27 = vadd.f32 %v318_v9, %v281_v16  ;;  %v334_v47 = vadd.f32 %v322_v55, %v285_v56 }
 0x107   :  { %869 = vrot.lane.b32.xlu1 %v1971_v63, %s1811_s18  ;;  %v332_v48 = vadd.f32 %v320_v17, %v283_v54  ;;  %v323_v11 = vmul.f32 %v1559_v61, %v2198_v40  ;;  %v368_v35 = vadd.f32 %v2194_v51, %v331_v45  ;;  %v370_v20 = vadd.f32 %v2194_v51, %v333_v39 }
 0x108   :  { %939 = vrot.lane.b32.xlu0 %v1999_v2, %s1810_s16  ;;  %v336_v43 = vadd.f32 %v324_v21, %v287_v41  ;;  %v325_v63 = vmul.f32 %v1560_v23, %v2198_v40  ;;  %v327_v46 = vmul.f32 %v1564_v24, %v2198_v40  ;;  %v326_v9 = vmul.f32 %v2198_v40, %v2129_v29 }
 0x109   :  { %v2386_v28 = vpop.permute.xlu1 %520  ;;  %v289_v22 = vadd.f32 %v277_v25, %v240_v15  ;;  %v329_v18 = vmul.f32 %v1565_v52, %v2198_v40  ;;  %v404_v45 = vmul.f32 %v2320_v49, %v2131_v30  ;;  %v328_v19 = vmul.f32 %v2198_v40, %v2137_v31  ;;  %v3643_v25 = vld [vmem:[#allocation26_spill] sm:$0xff] }
 0x10a   :  { %v2392_v12 = vpop.permute.xlu0 %526  ;;  %v291_v55 = vadd.f32 %v279_v26, %v242_v0  ;;  %v367_v39 = vadd.f32 %v2204_v42, %v330_v27  ;;  %v1570_v16 = vunpack.i.h.bf16 %v2145_v33  ;;  %v371_v29 = vadd.f32 %v2216_v36, %v334_v47  ;;  %v3644_v27 = vld [vmem:[#allocation18_spill] sm:$0xff] }
 0x10b   :  { %937 = vrot.lane.b32.xlu1 %v2005_v3, %s1810_s16  ;;  %v335_v15 = vadd.f32 %v323_v11, %v286_v14  ;;  %v369_v17 = vadd.f32 %v2207_v37, %v332_v48  ;;  %v1569_v30 = vunpack.i.l.bf16 %v2145_v33  ;;  %v453_v31 = vmul.f32 %v2329_v50, %v2179_v44  ;;  %v3641_v44 = vld [vmem:[#allocation17_spill] sm:$0xff]  ;;  %v3645_v48 = vld [vmem:[#allocation31_spill] sm:$0xff] }
 0x10c   :  { %943 = vrot.lane.b32.xlu0 %v2007_v4, %s1810_s16  ;;  %v337_v0 = vadd.f32 %v325_v63, %v288_v59  ;;  %v339_v61 = vadd.f32 %v327_v46, %v290_v10  ;;  %v338_v42 = vadd.f32 %v326_v9, %v289_v22  ;;  %v373_v56 = vadd.f32 %v2246_v58, %v336_v43  ;;  %v3642_v58 = vld [vmem:[#allocation23_spill] sm:$0xff] }
 0x10d   :  { %v2410_v40 = vpop.permute.xlu1 %524  ;;  %v2416_v36 = vadd.f32 %v329_v18, %v2334_v34  ;;  %v416_v23 = vadd.f32 %v404_v45, %v367_v39  ;;  %v340_v24 = vadd.f32 %v328_v19, %v291_v55  ;;  %v406_v33 = vmul.f32 %v2320_v49, %v2139_v32 }
 0x10e   :  { %v2413_v21 = vpop.permute.xlu0 %530  ;;  %v407_v37 = vmul.f32 %v1570_v16, %v2320_v49  ;;  %v1575_v10 = vunpack.i.h.bf16 %v3641_v44  ;;  %v1574_v59 = vunpack.i.l.bf16 %v3641_v44  ;;  %v1584_v14 = vunpack.i.l.bf16 %v3642_v58 }
 0x10f   :  { %941 = vrot.lane.b32.xlu1 %v2013_v5, %s1810_s16  ;;  %v405_v34 = vmul.f32 %v1569_v30, %v2320_v49  ;;  %v372_v54 = vadd.f32 %v2194_v51, %v335_v15  ;;  %v465_v32 = vadd.f32 %v453_v31, %v416_v23  ;;  %v455_v52 = vmul.f32 %v2329_v50, %v3643_v25  ;;  %v3647_v30 = vld [vmem:[#allocation29_spill] sm:$0xff] }
 0x110   :  { %947 = vrot.lane.b32.xlu0 %v2015_v6, %s1810_s16  ;;  %v374_v26 = vadd.f32 %v2194_v51, %v337_v0  ;;  %v408_v47 = vmul.f32 %v2320_v49, %v3644_v27  ;;  %v375_v11 = vadd.f32 %v3645_v48, %v338_v42  ;;  %v2439_v43 = vadd.f32 %v2194_v51, %v339_v61  ;;  %v3649_v42 = vld [vmem:[#allocation20_spill] sm:$0xff]  ;;  %v3653_v25 = vld [vmem:[#allocation33_spill] sm:$0xff]  ;;  %v3654_v27 = vld [vmem:[#allocation14_spill] sm:$0xff] }
 0x111   :  { %v2432_v41 = vpop.permute.xlu1 %528  ;;  %v418_v46 = vadd.f32 %v406_v33, %v369_v17  ;;  %v377_v9 = vadd.f32 %v2288_v13, %v340_v24  ;;  %v1585_v22 = vunpack.i.h.bf16 %v3642_v58  ;;  %v539_v18 = vmul.f32 %v2339_v53, %v2308_v38  ;;  %v3646_v13 = vld [vmem:[#allocation24_spill] sm:$0xff]  ;;  %v3650_v24 = vld [vmem:[#allocation21_spill] sm:$0xff] }
 0x112   :  { %v2441_v63 = vpop.permute.xlu0 %534  ;;  %v419_v45 = vadd.f32 %v407_v37, %v370_v20  ;;  %v411_v19 = vmul.f32 %v1575_v10, %v2320_v49  ;;  %v409_v55 = vmul.f32 %v1574_v59, %v2320_v49  ;;  %v454_v39 = vmul.f32 %v1584_v14, %v2329_v50  ;;  %v3648_v20 = vld [vmem:[#allocation19_spill] sm:$0xff]  ;;  %v3651_v59 = vld [vmem:[#allocation13_spill] sm:$0xff]  ;;  %v3655_v48 = vld [vmem:[#allocation28_spill] sm:$0xff] }
 0x113   :  { %945 = vrot.lane.b32.xlu1 %v2021_v7, %s1810_s16  ;;  %v417_v16 = vadd.f32 %v405_v34, %v368_v35  ;;  %v457_v15 = vmul.f32 %v2329_v50, %v3646_v13  ;;  %v467_v17 = vadd.f32 %v455_v52, %v418_v46  ;;  %v502_v38 = vadd.f32 %v3647_v30, %v465_v32 }
 0x114   :  { %951 = vrot.lane.b32.xlu0 %v2023_v8, %s1810_s16  ;;  %v420_v0 = vadd.f32 %v408_v47, %v371_v29  ;;  %v412_v61 = vmul.f32 %v2320_v49, %v3648_v20  ;;  %v410_v23 = vmul.f32 %v2320_v49, %v3649_v42  ;;  %v414_v33 = vmul.f32 %v2320_v49, %v3650_v24  ;;  %v3652_v29 = vld [vmem:[#allocation44_spill] sm:$0xff] }
 0x115   :  { %v2457_v31 = vpop.permute.xlu1 %532  ;;  %v456_v35 = vmul.f32 %v1585_v22, %v2329_v50  ;;  %v551_v44 = vadd.f32 %v539_v18, %v502_v38  ;;  %v541_v10 = vmul.f32 %v2339_v53, %v2341_v60  ;;  %v2471_v14 = vadd.f32 %v411_v19, %v374_v26  ;;  %v3656_v60 = vld [vmem:[#allocation27_spill] sm:$0xff]  ;;  %v3660_v20 = vld [vmem:[#allocation40_spill] sm:$0xff] }
 0x116   :  { %v564_v37 = vpop.permute.xlu0 %563  ;;  %v421_v34 = vadd.f32 %v409_v55, %v372_v54  ;;  %v466_v32 = vadd.f32 %v454_v39, %v417_v16  ;;  %v1589_v52 = vunpack.i.l.bf16 %v3653_v25  ;;  %v469_v47 = vadd.f32 %v457_v15, %v420_v0  ;;  %v3657_v15 = vld [vmem:[#allocation15_spill] sm:$0xff]  ;;  %v3661_v42 = vld [vmem:[#allocation32_spill] sm:$0xff] }
 0x117   :  { %949 = vrot.lane.b32.xlu1 %v3651_v59, %s1810_s16  ;;  %v588_v58 = vmul.f32 %v3652_v29, %v564_v37  ;;  %v459_v46 = vmul.f32 %v2329_v50, %v3655_v48  ;;  %v504_v22 = vadd.f32 %v3656_v60, %v467_v17  ;;  %v424_v30 = vadd.f32 %v412_v61, %v375_v11  ;;  %v3658_v11 = vld [vmem:[#allocation22_spill] sm:$0xff]  ;;  %v3664_v60 = vld [vmem:[#allocation36_spill] sm:$0xff] }
 0x118   :  { %955 = vrot.lane.b32.xlu0 %v3654_v27, %s1810_s16  ;;  %v422_v38 = vadd.f32 %v410_v23, %v373_v56  ;;  %v426_v26 = vadd.f32 %v414_v33, %v377_v9  ;;  %v540_v54 = vmul.f32 %v2339_v53, %v2364_v62  ;;  %v468_v55 = vadd.f32 %v456_v35, %v419_v45  ;;  %v3659_v17 = vld [vmem:[#allocation30_spill] sm:$0xff] }
 0x119   :  { %v600_v18 = vadd.f32 %v588_v58, %v551_v44  ;;  %v2479_v13 = vpop.permute.xlu1 %536  ;;  %v553_v39 = vadd.f32 %v541_v10, %v504_v22  ;;  %v543_v16 = vmul.f32 %v2339_v53, %v2370_v57  ;;  %v1580_v9 = vunpack.i.h.bf16 %v3658_v11 }
 0x11a   :  { %v568_v19 = vpop.permute.xlu0 %567  ;;  %v1590_v62 = vunpack.i.h.bf16 %v3653_v25  ;;  %v458_v45 = vmul.f32 %v1589_v52, %v2329_v50  ;;  %v503_v0 = vadd.f32 %v3659_v17, %v466_v32  ;;  %v471_v57 = vadd.f32 %v459_v46, %v422_v38  ;;  %v3662_v25 = vld [vmem:[#allocation34_spill] sm:$0xff]  ;;  %v3665_v38 = vld [vmem:[#allocation43_spill] sm:$0xff] }
 0x11b   :  { %613 = vst.msk [vmem:[%s3567_s4] sm:$0xff] %vm612_vm1, %v600_v18  ;;  %953 = vrot.lane.b32.xlu1 %v3657_v15, %s1810_s16  ;;  %v590_v56 = vmul.f32 %v3652_v29, %v568_v19  ;;  %v461_v61 = vmul.f32 %v2329_v50, %v3660_v20  ;;  %v506_v23 = vadd.f32 %v3661_v42, %v469_v47  ;;  %v1579_v37 = vunpack.i.l.bf16 %v3658_v11  ;;  %v3663_v47 = vld [vmem:[#allocation16_spill] sm:$0xff]  ;;  %v3666_v19 = vld [vmem:[#allocation35_spill] sm:$0xff] }
 0x11c   :  { %984 = vrot.lane.b32.xlu0 %v1993_v1, %s1811_s18  ;;  %v552_v35 = vadd.f32 %v540_v54, %v503_v0  ;;  %v542_v44 = vmul.f32 %v2339_v53, %v2386_v28  ;;  %v505_v1 = vadd.f32 %v3662_v25, %v468_v55  ;;  %v545_v52 = vmul.f32 %v2339_v53, %v2392_v12  ;;  %v3669_v25 = vld [vmem:[#allocation39_spill] sm:$0xff] }
 0x11d   :  { %v602_v24 = vadd.f32 %v590_v56, %v553_v39  ;;  %v566_v33 = vpop.permute.xlu1 %565  ;;  %v555_v32 = vadd.f32 %v543_v16, %v506_v23  ;;  %v460_v28 = vmul.f32 %v1590_v62, %v2329_v50  ;;  %v470_v46 = vadd.f32 %v458_v45, %v421_v34 }
 0x11e   :  { %v589_v10 = vmul.f32 %v3652_v29, %v566_v33  ;;  %v572_v58 = vpop.permute.xlu0 %571  ;;  %v1594_v22 = vunpack.i.l.bf16 %v3664_v60  ;;  %v473_v12 = vadd.f32 %v461_v61, %v424_v30  ;;  %v463_v54 = vmul.f32 %v2329_v50, %v3665_v38  ;;  %v3667_v61 = vld [vmem:[#allocation37_spill] sm:$0xff]  ;;  %v3668_v33 = vld [vmem:[#allocation38_spill] sm:$0xff] }
 0x11f   :  { %616 = vst.msk [vmem:[%s3567_s4 + $0x30] sm:$0xff] %vm612_vm1, %v602_v24  ;;  %957 = vrot.lane.b32.xlu1 %v3663_v47, %s1810_s16  ;;  %v592_v48 = vmul.f32 %v3652_v29, %v572_v58  ;;  %v508_v55 = vadd.f32 %v3666_v19, %v471_v57  ;;  %v413_v56 = vmul.f32 %v1579_v37, %v2320_v49  ;;  %v1595_v45 = vunpack.i.h.bf16 %v3664_v60 }
 0x120   :  { %v601_v18 = vadd.f32 %v589_v10, %v552_v35  ;;  %988 = vrot.lane.b32.xlu0 %v1999_v2, %s1811_s18  ;;  %v554_v11 = vadd.f32 %v542_v44, %v505_v1  ;;  %v544_v34 = vmul.f32 %v2339_v53, %v2410_v40  ;;  %v547_v0 = vmul.f32 %v2339_v53, %v2413_v21 }
 0x121   :  { %v604_v39 = vadd.f32 %v592_v48, %v555_v32  ;;  %v570_v16 = vpop.permute.xlu1 %569  ;;  %v557_v17 = vadd.f32 %v545_v52, %v508_v55  ;;  %v472_v57 = vadd.f32 %v460_v28, %v2471_v14  ;;  %v462_v20 = vmul.f32 %v1594_v22, %v2329_v50 }
 0x122   :  { %615 = vst.msk [vmem:[%s3567_s4 + $0x8] sm:$0x1] %vm614_vm2, %v601_v18  ;;  %v591_v30 = vmul.f32 %v3652_v29, %v570_v16  ;;  %v576_v62 = vpop.permute.xlu0 %575  ;;  %v507_v42 = vadd.f32 %v3667_v61, %v470_v46  ;;  %v415_v21 = vmul.f32 %v1580_v9, %v2320_v49  ;;  %v475_v24 = vadd.f32 %v463_v54, %v426_v26  ;;  %v3672_v54 = vld [vmem:[#allocation42_spill] sm:$0xff]  ;;  %v2639_v61 = vld [vmem:[#allocation2 + $0x20] sm:$0xff] }
 0x123   :  { %618 = vst.msk [vmem:[%s3567_s4 + $0x60] sm:$0xff] %vm612_vm1, %v604_v39  ;;  %986 = vrot.lane.b32.xlu1 %v2005_v3, %s1811_s18  ;;  %v594_v40 = vmul.f32 %v3652_v29, %v576_v62  ;;  %v510_v37 = vadd.f32 %v3668_v33, %v473_v12  ;;  %v425_v3 = vadd.f32 %v413_v56, %v2439_v43  ;;  %3675 = vst [vmem:[#allocation23_spill] sm:$0xff] %v2639_v61  ;;  %v2655_v33 = vld [vmem:[#allocation2 + $0x50] sm:$0xff] }
 0x124   :  { %v603_v23 = vadd.f32 %v591_v30, %v554_v11  ;;  %992 = vrot.lane.b32.xlu0 %v2007_v4, %s1811_s18  ;;  %v556_v10 = vadd.f32 %v544_v34, %v507_v42  ;;  %v546_v14 = vmul.f32 %v2339_v53, %v2432_v41  ;;  %v378_v49 = vadd.f32 %v2194_v51, %v2416_v36  ;;  %v3670_v36 = vld [vmem:[#allocation41_spill] sm:$0xff] }
 0x125   :  { %v606_v35 = vadd.f32 %v594_v40, %v557_v17  ;;  %v574_v44 = vpop.permute.xlu1 %573  ;;  %v559_v26 = vadd.f32 %v547_v0, %v510_v37  ;;  %v549_v9 = vmul.f32 %v2339_v53, %v2441_v63  ;;  %v464_v43 = vmul.f32 %v1595_v45, %v2329_v50  ;;  %3678 = vst [vmem:[#allocation31_spill] sm:$0xff] %v2655_v33 }
 0x126   :  { %617 = vst.msk [vmem:[%s3567_s4 + $0x38] sm:$0x1] %vm614_vm2, %v603_v23  ;;  %v593_v4 = vmul.f32 %v3652_v29, %v574_v44  ;;  %v580_v58 = vpop.permute.xlu0 %579  ;;  %v474_v32 = vadd.f32 %v462_v20, %v425_v3  ;;  %v509_v1 = vadd.f32 %v3669_v25, %v472_v57  ;;  %v512_v63 = vadd.f32 %v3670_v36, %v475_v24  ;;  %v2643_v23 = vld [vmem:[#allocation2 + $0x40] sm:$0xff] }
 0x127   :  { %620 = vst.msk [vmem:[%s3567_s4 + $0x90] sm:$0xff] %vm612_vm1, %v606_v35  ;;  %990 = vrot.lane.b32.xlu1 %v2013_v5, %s1811_s18  ;;  %v596_v41 = vmul.f32 %v3652_v29, %v580_v58  ;;  %v427_v28 = vadd.f32 %v415_v21, %v378_v49  ;;  %v548_v60 = vmul.f32 %v2339_v53, %v2457_v31  ;;  %v3671_v31 = vld [vmem:[#allocation25_spill] sm:$0xff]  ;;  %v3674_v20 = vmov 0.0   ;;  %3676 = vst [vmem:[#allocation26_spill] sm:$0xff] %v2643_v23  ;;  %v2722_v36 = vld [vmem:[#allocation2 + $0x80] sm:$0xff] }
 0x128   :  { %v605_v51 = vadd.f32 %v593_v4, %v556_v10  ;;  %996 = vrot.lane.b32.xlu0 %v2015_v6, %s1811_s18  ;;  %v558_v46 = vadd.f32 %v546_v14, %v509_v1  ;;  %v561_v18 = vadd.f32 %v549_v9, %v512_v63  ;;  %v501_v12 = vmul.f32 %v3671_v31, %v3663_v47  ;;  %v2651_v21 = vld [vmem:[#allocation2 + $0x30] sm:$0xff]  ;;  %v2696_v9 = vld [vmem:[#allocation2 + $0x60] sm:$0xff]  ;;  %v2754_v31 = vld [vmem:[#allocation2 + $0x8] sm:$0xff] }
 0x129   :  { %v608_v52 = vadd.f32 %v596_v41, %v559_v26  ;;  %v578_v48 = vpop.permute.xlu1 %577  ;;  %v476_v38 = vadd.f32 %v464_v43, %v427_v28  ;;  %v511_v19 = vadd.f32 %v3672_v54, %v474_v32  ;;  %v550_v11 = vmul.f32 %v2339_v53, %v2479_v13  ;;  %v1048_v13 = vld [vmem:[#allocation2] sm:$0xff]  ;;  %3677 = vst [vmem:[#allocation18_spill] sm:$0xff] %v2651_v21  ;;  %v2706_v32 = vld [vmem:[#allocation2 + $0x70] sm:$0xff] }
 0x12a   :  { %619 = vst.msk [vmem:[%s3567_s4 + $0x68] sm:$0x1] %vm614_vm2, %v605_v51  ;;  %v595_v50 = vmul.f32 %v3652_v29, %v578_v48  ;;  %v584_v22 = vpop.permute.xlu0 %583  ;;  %3679 = vst [vmem:[#allocation24_spill] sm:$0xff] %v2696_v9  ;;  %v2734_v28 = vld [vmem:[#allocation2 + $0x90] sm:$0xff]  ;;  %v1717_v54 = vld [vmem:[#allocation2] sm:$0xff] }
 0x12b   :  { %622 = vst.msk [vmem:[%s3567_s4 + $0xc0] sm:$0xff] %vm612_vm1, %v608_v52  ;;  %994 = vrot.lane.b32.xlu1 %v2021_v7, %s1811_s18  ;;  %v598_v6 = vmul.f32 %v3652_v29, %v584_v22  ;;  %v560_v56 = vadd.f32 %v548_v60, %v511_v19  ;;  %3680 = vst [vmem:[#allocation29_spill] sm:$0xff] %v2706_v32  ;;  %v2726_v52 = vld [vmem:[#allocation2 + $0xa0] sm:$0xff]  ;;  %v2738_v60 = vld [vmem:[#allocation2 + $0xb0] sm:$0xff]  ;;  %v640_v22 = vstv %s1483_s25 }
 0x12c   :  { %v607_v55 = vadd.f32 %v595_v50, %v558_v46  ;;  %1000 = vrot.lane.b32.xlu0 %v2023_v8, %s1811_s18  ;;  %v513_v8 = vadd.f32 %v501_v12, %v476_v38  ;;  %3682 = vst [vmem:[#allocation20_spill] sm:$0xff] %v2722_v36  ;;  %3684 = vst [vmem:[#allocation13_spill] sm:$0xff] %v2726_v52  ;;  %v2757_v12 = vmul.f32 %v2754_v31, %v640_v22 }
 0x12d   :  { %v610_v39 = vadd.f32 %v598_v6, %v561_v18  ;;  %v582_v16 = vpop.permute.xlu1 %581  ;;  %3686 = vst [vmem:[#allocation33_spill] sm:$0xff] %v2734_v28  ;;  %3688 = vst [vmem:[#allocation28_spill] sm:$0xff] %v2754_v31  ;;  %v775_v38 = vstv %s1486_s26  ;;  %v641_v19 = vmul.f32 %v1717_v54, %v640_v22 }
 0x12e   :  { %621 = vst.msk [vmem:[%s3567_s4 + $0x98] sm:$0x1] %vm614_vm2, %v607_v55  ;;  %v597_v7 = vmul.f32 %v3652_v29, %v582_v16  ;;  %v2597_v34 = vpop.permute.xlu0 %665  ;;  %v562_v62 = vadd.f32 %v550_v11, %v513_v8  ;;  %v1718_v55 = vld [vmem:[#allocation2 + $0x10] sm:$0xff]  ;;  %v1719_v16 = vld [vmem:[#allocation2 + $0x20] sm:$0xff] }
 0x12f   :  { %624 = vst.msk [vmem:[%s3567_s4 + $0xf0] sm:$0xff] %vm612_vm1, %v610_v39  ;;  %998 = vrot.lane.b32.xlu1 %v3651_v59, %s1811_s18  ;;  %v643_v39 = vmul.f32 %v1718_v55, %v640_v22  ;;  %v1720_v11 = vld [vmem:[#allocation2 + $0x40] sm:$0xff]  ;;  %v1721_v8 = vld [vmem:[#allocation2 + $0x30] sm:$0xff] }
 0x130   :  { %v609_v30 = vadd.f32 %v597_v7, %v560_v56  ;;  %1004 = vrot.lane.b32.xlu0 %v3654_v27, %s1811_s18  ;;  %v2619_v27 = vld [vmem:[#allocation2 + $0x10] sm:$0xff]  ;;  %v645_v56 = vmul.f32 %v1719_v16, %v640_v22  ;;  %v2761_v7 = vmul.f32 %v1720_v11, %v640_v22  ;;  %v2776_v11 = vmul.f32 %v2754_v31, %v775_v38 }
 0x131   :  { %v586_v53 = vpop.permute.xlu1 %585  ;;  %3673 = vst [vmem:[#allocation17_spill] sm:$0xff] %v2619_v27  ;;  %v1724_v55 = vld [vmem:[#allocation2 + $0x70] sm:$0xff] }
 0x132   :  { %623 = vst.msk [vmem:[%s3567_s4 + $0xc8] sm:$0x1] %vm614_vm2, %v609_v30  ;;  %v599_v45 = vmul.f32 %v3652_v29, %v586_v53  ;;  %v2612_v17 = vpop.permute.xlu0 %669  ;;  %v647_v30 = vmul.f32 %v1721_v8, %v640_v22  ;;  %v1722_v53 = vld [vmem:[#allocation2 + $0x50] sm:$0xff]  ;;  %v2773_v16 = vmul.f32 %v1724_v55, %v775_v38  ;;  %v1726_v8 = vld [vmem:[#allocation2 + $0xa0] sm:$0xff] }
 0x133   :  { %1002 = vrot.lane.b32.xlu1 %v3657_v15, %s1811_s18 }
 0x134   :  { %v611_v0 = vadd.f32 %v599_v45, %v562_v62  ;;  %1085 = vrot.lane.b32.xlu0 %v1048_v13, %s1810_s16  ;;  %v1723_v62 = vld [vmem:[#allocation2 + $0x60] sm:$0xff] }
 0x135   :  { %v2617_v40 = vpop.permute.xlu1 %1597  ;;  %v2767_v45 = vmul.f32 %v1723_v62, %v775_v38 }
 0x136   :  { %625 = vst.msk [vmem:[%s3567_s4 + $0xf8] sm:$0x1] %vm614_vm2, %v611_v0  ;;  %v2625_v57 = vpop.permute.xlu0 %1602  ;;  %v2769_v0 = vstv %s1489_s2 }
 0x137   :  { %1006 = vrot.lane.b32.xlu1 %v3663_v47, %s1811_s18  ;;  %3689 = vst [vmem:[#allocation27_spill] sm:$0xff] %v2769_v0 }
 0x138   :  { %1089 = vrot.lane.b32.xlu0 %v2619_v27, %s1810_s16 }
 0x139   :  { %v2631_v29 = vpop.permute.xlu1 %673 }
 0x13a   :  { %v2633_v15 = vpop.permute.xlu0 %681 }
 0x13b   :  { %1657 = vrot.lane.b32.xlu1 %v3674_v20, %s1810_s16 }
 0x13c   :  { %1662 = vrot.lane.b32.xlu0 %v3674_v20, %s1810_s16 }
 0x13d   :  { %v2641_v42 = vpop.permute.xlu1 %677 }
 0x13e   :  { %v2645_v47 = vpop.permute.xlu0 %685 }
 0x13f   :  { %1093 = vrot.lane.b32.xlu1 %v2639_v61, %s1810_s16 }
 0x140   :  { %1101 = vrot.lane.b32.xlu0 %v2643_v23, %s1810_s16 }
 0x141   :  { %v2653_v24 = vpop.permute.xlu1 %1607 }
 0x142   :  { %v2657_v37 = vpop.permute.xlu0 %1612 }
 0x143   :  { %1097 = vrot.lane.b32.xlu1 %v2651_v21, %s1810_s16 }
 0x144   :  { %1105 = vrot.lane.b32.xlu0 %v2655_v33, %s1810_s16 }
 0x145   :  { %v2663_v35 = vpop.permute.xlu1 %714 }
 0x146   :  { %v2665_v44 = vpop.permute.xlu0 %722 }
 0x147   :  { %1667 = vrot.lane.b32.xlu1 %v3674_v20, %s1810_s16 }
 0x148   :  { %1672 = vrot.lane.b32.xlu0 %v3674_v20, %s1811_s18 }
 0x149   :  { %v2671_v3 = vpop.permute.xlu1 %718 }
 0x14a   :  { %v2673_v10 = vpop.permute.xlu0 %726 }
 0x14b   :  { %1134 = vrot.lane.b32.xlu1 %v1048_v13, %s1811_s18  ;;  %v2765_v13 = vmul.f32 %v1722_v53, %v640_v22  ;;  %v1727_v53 = vld [vmem:[#allocation2 + $0x90] sm:$0xff] }
 0x14c   :  { %1142 = vrot.lane.b32.xlu0 %v2639_v61, %s1811_s18  ;;  %v2786_v62 = vmul.f32 %v1727_v53, %v775_v38  ;;  %v1729_v61 = vld [vmem:[#allocation2 + $0xc0] sm:$0xff] }
 0x14d   :  { %v2678_v14 = vpop.permute.xlu1 %1617  ;;  %v2791_v31 = vmul.f32 %v1729_v61, %v2769_v0 }
 0x14e   :  { %v2680_v4 = vpop.permute.xlu0 %1622 }
 0x14f   :  { %1138 = vrot.lane.b32.xlu1 %v2619_v27, %s1811_s18  ;;  %v1725_v27 = vld [vmem:[#allocation2 + $0x80] sm:$0xff] }
 0x150   :  { %1146 = vrot.lane.b32.xlu0 %v2651_v21, %s1811_s18  ;;  %v1728_v21 = vld [vmem:[#allocation2 + $0xb0] sm:$0xff] }
 0x151   :  { %v2686_v58 = vpop.permute.xlu1 %730  ;;  %v2788_v55 = vmul.f32 %v1728_v21, %v775_v38  ;;  %v1731_v21 = vld [vmem:[#allocation2 + $0xe0] sm:$0xff] }
 0x152   :  { %v2688_v49 = vpop.permute.xlu0 %800  ;;  %v2807_v61 = vmul.f32 %v1731_v21, %v2769_v0 }
 0x153   :  { %1677 = vrot.lane.b32.xlu1 %v3674_v20, %s1811_s18 }
 0x154   :  { %1682 = vrot.lane.b32.xlu0 %v3674_v20, %s1811_s18  ;;  %3693 = vst [vmem:[#allocation40_spill] sm:$0xff] %v2807_v61  ;;  %v1734_v61 = vld [vmem:[#allocation2 + $0x100] sm:$0xff] }
 0x155   :  { %v2694_v26 = vpop.permute.xlu1 %734 }
 0x156   :  { %v2698_v41 = vpop.permute.xlu0 %804 }
 0x157   :  { %1150 = vrot.lane.b32.xlu1 %v2643_v23, %s1811_s18  ;;  %v2780_v23 = vmul.f32 %v1726_v8, %v775_v38  ;;  %v1730_v8 = vld [vmem:[#allocation2 + $0xc8] sm:$0xff] }
 0x158   :  { %1220 = vrot.lane.b32.xlu0 %v2696_v9, %s1810_s16  ;;  %v2804_v53 = vmul.f32 %v1730_v8, %v2769_v0 }
 0x159   :  { %v2704_v43 = vpop.permute.xlu1 %1627 }
 0x15a   :  { %v2708_v25 = vpop.permute.xlu0 %1632  ;;  %3692 = vst [vmem:[#allocation30_spill] sm:$0xff] %v2804_v53  ;;  %v1733_v53 = vld [vmem:[#allocation2 + $0xe8] sm:$0xff] }
 0x15b   :  { %1154 = vrot.lane.b32.xlu1 %v2655_v33, %s1811_s18  ;;  %v2778_v33 = vmul.f32 %v1725_v27, %v775_v38  ;;  %v2795_v27 = vmul.f32 %v2769_v0, %v1999_v2  ;;  %v2811_v2 = vmul.f32 %v2769_v0, %v2013_v5  ;;  %v627_v38 = vstv %s2744_s27  ;;  %s1492_s27 = sld [smem:[#allocation7 + $0x12]] }
 0x15c   :  { %1224 = vrot.lane.b32.xlu0 %v2706_v32, %s1810_s16  ;;  %v2824_v21 = vmul.f32 %v1733_v53, %v2769_v0  ;;  %v2827_v5 = vmul.f32 %v1734_v61, %v2769_v0  ;;  %v1735_v53 = vld [vmem:[#allocation2 + $0x110] sm:$0xff]  ;;  %v1736_v61 = vld [vmem:[#allocation2 + $0x108] sm:$0xff] }
 0x15d   :  { %v2714_v1 = vpop.permute.xlu1 %808  ;;  %3691 = vst [vmem:[#allocation22_spill] sm:$0xff] %v2795_v27  ;;  %3694 = vst [vmem:[#allocation32_spill] sm:$0xff] %v2811_v2  ;;  %v2831_v2 = vmul.f32 %v2769_v0, %v3651_v59  ;;  %v1600_v27 = vunpack.i.h.bf16 %v2617_v40  ;;  %v653_v59 = vadd.f32 %v641_v19, %v627_v38 }
 0x15e   :  { %v2716_v51 = vpop.permute.xlu0 %816  ;;  %3696 = vst [vmem:[#allocation16_spill] sm:$0xff] %v2824_v21  ;;  %3697 = vst [vmem:[#allocation36_spill] sm:$0xff] %v2827_v5  ;;  %v2842_v21 = vmul.f32 %v1735_v53, %v2769_v0  ;;  %v2845_v5 = vmul.f32 %v1736_v61, %v2769_v0  ;;  %v659_v61 = vadd.f32 %v647_v30, %v627_v38  ;;  %v2874_v30 = vstv %s2799_s5  ;;  %s1514_s5 = sld [smem:[#allocation9 + $0x2]] }
 0x15f   :  { %3681 = vst [vmem:[#allocation19_spill] sm:$0xff] %v2716_v51  ;;  %1687 = vrot.lane.b32.xlu1 %v3674_v20, %s1810_s16  ;;  %3698 = vst [vmem:[#allocation43_spill] sm:$0xff] %v2831_v2  ;;  %v1604_v2 = vunpack.i.l.bf16 %v2625_v57 }
 0x160   :  { %1692 = vrot.lane.b32.xlu0 %v3674_v20, %s1810_s16  ;;  %3701 = vst [vmem:[#allocation38_spill] sm:$0xff] %v2842_v21  ;;  %3702 = vst [vmem:[#allocation39_spill] sm:$0xff] %v2845_v5  ;;  %v2864_v21 = vstv %s2782_s29 }
 0x161   :  { %v2724_v63 = vpop.permute.xlu1 %812 }
 0x162   :  { %3683 = vst [vmem:[#allocation21_spill] sm:$0xff] %v2724_v63  ;;  %v2728_v48 = vpop.permute.xlu0 %820 }
 0x163   :  { %3685 = vst [vmem:[#allocation44_spill] sm:$0xff] %v2728_v48  ;;  %1228 = vrot.lane.b32.xlu1 %v2722_v36, %s1810_s16  ;;  %v2888_v48 = vld [vmem:[#allocation2 + $0xc0] sm:$0xff] }
 0x164   :  { %1236 = vrot.lane.b32.xlu0 %v2726_v52, %s1810_s16  ;;  %3706 = vst [vmem:[#allocation45_spill] sm:$0xff] %v2888_v48 }
 0x165   :  { %v2736_v46 = vpop.permute.xlu1 %1637 }
 0x166   :  { %3687 = vst [vmem:[#allocation14_spill] sm:$0xff] %v2736_v46  ;;  %v2740_v50 = vpop.permute.xlu0 %1642  ;;  %v689_v46 = vstv %s2750_s28 }
 0x167   :  { %1232 = vrot.lane.b32.xlu1 %v2734_v28, %s1810_s16  ;;  %v690_v53 = vmul.f32 %v689_v46, %v2597_v34  ;;  %v692_v19 = vmul.f32 %v689_v46, %v2612_v17  ;;  %v1614_v34 = vunpack.i.l.bf16 %v2657_v37  ;;  %v2868_v17 = vstv %s2797_s30  ;;  %s1493_s30 = sld [smem:[#allocation7 + $0x13]] }
 0x168   :  { %1240 = vrot.lane.b32.xlu0 %v2738_v60, %s1810_s16 }
 0x169   :  { %v2748_v18 = vpop.permute.xlu1 %849 }
 0x16a   :  { %v2752_v6 = vpop.permute.xlu0 %857 }
 0x16b   :  { %1697 = vrot.lane.b32.xlu1 %v3674_v20, %s1810_s16 }
 0x16c   :  { %1702 = vrot.lane.b32.xlu0 %v3674_v20, %s1811_s18 }
 0x16d   :  { %v2771_v54 = vpop.permute.xlu1 %853 }
 0x16e   :  { %v2784_v22 = vpop.permute.xlu0 %861 }
 0x16f   :  { %3690 = vst [vmem:[#allocation15_spill] sm:$0xff] %v2784_v22  ;;  %1269 = vrot.lane.b32.xlu1 %v2696_v9, %s1811_s18  ;;  %v1732_v9 = vld [vmem:[#allocation2 + $0xf0] sm:$0xff] }
 0x170   :  { %1277 = vrot.lane.b32.xlu0 %v2722_v36, %s1811_s18  ;;  %v2821_v8 = vmul.f32 %v1732_v9, %v2769_v0  ;;  %v1599_v9 = vunpack.i.l.bf16 %v2617_v40  ;;  %v655_v40 = vadd.f32 %v643_v39, %v627_v38  ;;  %v693_v39 = vmul.f32 %v1600_v27, %v689_v46 }
 0x171   :  { %v2833_v36 = vpop.permute.xlu1 %1647  ;;  %v2877_v27 = vstv %s2816_s6  ;;  %s1494_s6 = sld [smem:[#allocation7 + $0x14]] }
 0x172   :  { %3695 = vst [vmem:[#allocation34_spill] sm:$0xff] %v2821_v8  ;;  %3699 = vst [vmem:[#allocation35_spill] sm:$0xff] %v2833_v36  ;;  %v1605_v8 = vunpack.i.h.bf16 %v2625_v57  ;;  %v2839_v22 = vpop.permute.xlu0 %1652  ;;  %v2851_v36 = vadd.f32 %v2757_v12, %v627_v38  ;;  %v661_v57 = vadd.f32 %v2761_v7, %v627_v38  ;;  %v691_v12 = vmul.f32 %v1599_v9, %v689_v46 }
 0x173   :  { %3700 = vst [vmem:[#allocation37_spill] sm:$0xff] %v2839_v22  ;;  %1273 = vrot.lane.b32.xlu1 %v2706_v32, %s1811_s18  ;;  %v657_v22 = vadd.f32 %v645_v56, %v627_v38  ;;  %v663_v56 = vadd.f32 %v2765_v13, %v627_v38  ;;  %v1615_v7 = vunpack.i.h.bf16 %v2657_v37  ;;  %v2882_v13 = vstv %s2818_s7  ;;  %s1498_s7 = sld [smem:[#allocation7 + $0x18]] }
 0x174   :  { %1281 = vrot.lane.b32.xlu0 %v2734_v28, %s1811_s18  ;;  %v697_v5 = vmul.f32 %v1605_v8, %v689_v46  ;;  %v695_v28 = vmul.f32 %v1604_v2, %v689_v46  ;;  %3704 = vst [vmem:[#allocation25_spill] sm:$0xff] %v2882_v13  ;;  %v702_v2 = vadd.f32 %v690_v53, %v653_v59  ;;  %v1610_v8 = vunpack.i.h.bf16 %v2653_v24 }
 0x175   :  { %v2858_v32 = vpop.permute.xlu1 %865  ;;  %v704_v38 = vadd.f32 %v692_v19, %v655_v40  ;;  %v1609_v9 = vunpack.i.l.bf16 %v2653_v24  ;;  %v705_v37 = vadd.f32 %v693_v39, %v2851_v36  ;;  %v703_v63 = vadd.f32 %v691_v12, %v2851_v36 }
 0x176   :  { %3703 = vst [vmem:[#allocation41_spill] sm:$0xff] %v2858_v32  ;;  %v2861_v0 = vpop.permute.xlu0 %935  ;;  %v2893_v51 = vadd.f32 %v697_v5, %v2851_v36  ;;  %v707_v59 = vadd.f32 %v695_v28, %v2851_v36  ;;  %v698_v40 = vmul.f32 %v689_v46, %v2633_v15  ;;  %v696_v24 = vmul.f32 %v689_v46, %v2641_v42 }
 0x177   :  { %1707 = vrot.lane.b32.xlu1 %v3674_v20, %s1811_s18  ;;  %v740_v53 = vmul.f32 %v1614_v34, %v2864_v21  ;;  %v700_v19 = vmul.f32 %v689_v46, %v2645_v47  ;;  %v742_v5 = vmul.f32 %v1615_v7, %v2864_v21  ;;  %v743_v39 = vmul.f32 %v2864_v21, %v2665_v44  ;;  %v2917_v47 = vld [vmem:[#allocation2 + $0xd0] sm:$0xff] }
 0x178   :  { %1712 = vrot.lane.b32.xlu0 %v3674_v20, %s1811_s18  ;;  %v694_v20 = vmul.f32 %v689_v46, %v2631_v29  ;;  %v739_v29 = vmul.f32 %v2864_v21, %v2663_v35  ;;  %v701_v15 = vmul.f32 %v1610_v8, %v689_v46  ;;  %v699_v42 = vmul.f32 %v1609_v9, %v689_v46 }
 0x179   :  { %v2886_v32 = vpop.permute.xlu1 %869  ;;  %v741_v28 = vmul.f32 %v2864_v21, %v2671_v3  ;;  %v1619_v12 = vunpack.i.l.bf16 %v2678_v14  ;;  %v745_v35 = vmul.f32 %v2864_v21, %v2673_v10  ;;  %v1620_v44 = vunpack.i.h.bf16 %v2678_v14  ;;  %v2930_v10 = vld [vmem:[#allocation2 + $0xc8] sm:$0xff] }
 0x17a   :  { %3705 = vst [vmem:[#allocation42_spill] sm:$0xff] %v2886_v32  ;;  %v2896_v13 = vpop.permute.xlu0 %939  ;;  %v706_v7 = vadd.f32 %v694_v20, %v657_v22  ;;  %v710_v46 = vadd.f32 %v698_v40, %v661_v57  ;;  %v708_v8 = vadd.f32 %v696_v24, %v659_v61  ;;  %v752_v9 = vadd.f32 %v740_v53, %v703_v63  ;;  %v2937_v40 = vld [vmem:[#allocation2 + $0xe0] sm:$0xff] }
 0x17b   :  { %1285 = vrot.lane.b32.xlu1 %v2726_v52, %s1811_s18  ;;  %v1624_v52 = vunpack.i.l.bf16 %v2680_v4  ;;  %v1625_v3 = vunpack.i.h.bf16 %v2680_v4  ;;  %v751_v22 = vadd.f32 %v739_v29, %v702_v2  ;;  %v713_v14 = vadd.f32 %v701_v15, %v2851_v36 }
 0x17c   :  { %1355 = vrot.lane.b32.xlu0 %v2888_v48, %s1810_s16  ;;  %v712_v48 = vadd.f32 %v700_v19, %v663_v56  ;;  %v755_v20 = vadd.f32 %v743_v39, %v706_v7  ;;  %v711_v57 = vadd.f32 %v699_v42, %v2851_v36  ;;  %v753_v61 = vadd.f32 %v741_v28, %v704_v38  ;;  %v2967_v28 = vld [vmem:[#allocation2 + $0xf0] sm:$0xff] }
 0x17d   :  { %v2915_v34 = vpop.permute.xlu1 %937  ;;  %v744_v63 = vmul.f32 %v1619_v12, %v2864_v21  ;;  %v757_v56 = vadd.f32 %v745_v35, %v708_v8  ;;  %v746_v2 = vmul.f32 %v1620_v44, %v2864_v21  ;;  %v747_v24 = vmul.f32 %v2864_v21, %v2686_v58  ;;  %v2987_v8 = vld [vmem:[#allocation2 + $0xe8] sm:$0xff] }
 0x17e   :  { %3707 = vst [vmem:[#allocation46_spill] sm:$0xff] %v2915_v34  ;;  %v2923_v32 = vpop.permute.xlu0 %943  ;;  %v754_v34 = vadd.f32 %v742_v5, %v705_v37  ;;  %v748_v37 = vmul.f32 %v1624_v52, %v2864_v21  ;;  %v750_v19 = vmul.f32 %v1625_v3, %v2864_v21  ;;  %v825_v36 = vmul.f32 %v2868_v17, %v2688_v49  ;;  %v2959_v49 = vld [vmem:[#allocation2 + $0xd8] sm:$0xff] }
 0x17f   :  { %1289 = vrot.lane.b32.xlu1 %v2738_v60, %s1811_s18  ;;  %v749_v38 = vmul.f32 %v2864_v21, %v2694_v26  ;;  %v789_v5 = vadd.f32 %v2776_v11, %v752_v9  ;;  %v788_v52 = vadd.f32 %v2767_v45, %v751_v22  ;;  %v1629_v29 = vunpack.i.l.bf16 %v2704_v43 }
 0x180   :  { %1359 = vrot.lane.b32.xlu0 %v2917_v47, %s1810_s16  ;;  %v791_v58 = vadd.f32 %v2776_v11, %v754_v34  ;;  %v792_v39 = vadd.f32 %v2778_v33, %v755_v20  ;;  %v756_v15 = vadd.f32 %v744_v63, %v707_v59  ;;  %v790_v26 = vadd.f32 %v2773_v16, %v753_v61  ;;  %v2995_v20 = vld [vmem:[#allocation2 + $0x100] sm:$0xff] }
 0x181   :  { %v2935_v4 = vpop.permute.xlu1 %941  ;;  %v1630_v21 = vunpack.i.h.bf16 %v2704_v43  ;;  %v874_v42 = vmul.f32 %v2874_v30, %v2748_v18  ;;  %v758_v12 = vadd.f32 %v746_v2, %v2893_v51  ;;  %v760_v33 = vadd.f32 %v748_v37, %v711_v57 }
 0x182   :  { %v2943_v53 = vpop.permute.xlu0 %947  ;;  %v759_v34 = vadd.f32 %v747_v24, %v710_v46  ;;  %v2971_v7 = vadd.f32 %v2786_v62, %v757_v56  ;;  %v2975_v59 = vadd.f32 %v750_v19, %v713_v14  ;;  %v837_v16 = vadd.f32 %v825_v36, %v788_v52  ;;  %v3017_v36 = vld [vmem:[#allocation2 + $0xf8] sm:$0xff] }
 0x183   :  { %1357 = vrot.lane.b32.xlu1 %v2930_v10, %s1810_s16  ;;  %v761_v43 = vadd.f32 %v749_v38, %v712_v48  ;;  %v827_v18 = vmul.f32 %v2868_v17, %v2698_v41  ;;  %v826_v44 = vmul.f32 %v1629_v29, %v2868_v17  ;;  %v1635_v51 = vunpack.i.h.bf16 %v2708_v25 }
 0x184   :  { %1363 = vrot.lane.b32.xlu0 %v2937_v40, %s1810_s16  ;;  %v1634_v46 = vunpack.i.l.bf16 %v2708_v25  ;;  %v1644_v62 = vunpack.i.l.bf16 %v2740_v50  ;;  %v828_v48 = vmul.f32 %v1630_v21, %v2868_v17  ;;  %v793_v41 = vadd.f32 %v2776_v11, %v756_v15  ;;  %v3708_v15 = vld [vmem:[#allocation19_spill] sm:$0xff]  ;;  %v3709_v21 = vld [vmem:[#allocation21_spill] sm:$0xff] }
 0x185   :  { %v2965_v45 = vpop.permute.xlu1 %945  ;;  %v886_v9 = vadd.f32 %v874_v42, %v837_v16  ;;  %v876_v3 = vmul.f32 %v2874_v30, %v2771_v54  ;;  %v795_v25 = vadd.f32 %v2776_v11, %v758_v12  ;;  %v829_v14 = vmul.f32 %v2868_v17, %v2714_v1  ;;  %v3710_v12 = vld [vmem:[#allocation44_spill] sm:$0xff] }
 0x186   :  { %v2973_v35 = vpop.permute.xlu0 %951  ;;  %v796_v57 = vadd.f32 %v2780_v23, %v759_v34  ;;  %v3002_v61 = vadd.f32 %v2776_v11, %v760_v33  ;;  %v839_v56 = vadd.f32 %v827_v18, %v790_v26  ;;  %v798_v2 = vadd.f32 %v2788_v55, %v761_v43 }
 0x187   :  { %1361 = vrot.lane.b32.xlu1 %v2959_v49, %s1810_s16  ;;  %v1645_v54 = vunpack.i.h.bf16 %v2740_v50  ;;  %v960_v37 = vmul.f32 %v2877_v27, %v2861_v0  ;;  %v838_v24 = vadd.f32 %v826_v44, %v789_v5  ;;  %v832_v1 = vmul.f32 %v1635_v51, %v2868_v17  ;;  %v3024_v5 = vld [vmem:[#allocation2 + $0x110] sm:$0xff]  ;;  %v3712_v51 = vld [vmem:[#allocation35_spill] sm:$0xff] }
 0x188   :  { %1367 = vrot.lane.b32.xlu0 %v2967_v28, %s1810_s16  ;;  %v830_v23 = vmul.f32 %v1634_v46, %v2868_v17  ;;  %v875_v19 = vmul.f32 %v1644_v62, %v2874_v30  ;;  %v840_v55 = vadd.f32 %v828_v48, %v791_v58  ;;  %v878_v50 = vmul.f32 %v2874_v30, %v2752_v6  ;;  %v3043_v62 = vld [vmem:[#allocation2 + $0x108] sm:$0xff] }
 0x189   :  { %v2993_v22 = vpop.permute.xlu1 %949  ;;  %v888_v0 = vadd.f32 %v876_v3, %v839_v56  ;;  %v923_v38 = vadd.f32 %v2791_v31, %v886_v9  ;;  %v841_v29 = vadd.f32 %v829_v14, %v792_v39  ;;  %v833_v26 = vmul.f32 %v2868_v17, %v3708_v15  ;;  %v3711_v39 = vld [vmem:[#allocation25_spill] sm:$0xff]  ;;  %v3713_v9 = vld [vmem:[#allocation15_spill] sm:$0xff]  ;;  %v3714_v3 = vld [vmem:[#allocation22_spill] sm:$0xff] }
 0x18a   :  { %v3004_v63 = vpop.permute.xlu0 %955  ;;  %v831_v42 = vmul.f32 %v2868_v17, %v3709_v21  ;;  %v835_v58 = vmul.f32 %v2868_v17, %v3710_v12  ;;  %v877_v6 = vmul.f32 %v1645_v54, %v2874_v30  ;;  %v962_v31 = vmul.f32 %v2877_v27, %v2896_v13 }
 0x18b   :  { %1365 = vrot.lane.b32.xlu1 %v2987_v8, %s1810_s16  ;;  %v972_v34 = vadd.f32 %v960_v37, %v923_v38  ;;  %v842_v43 = vadd.f32 %v830_v23, %v793_v41  ;;  %v3038_v18 = vadd.f32 %v832_v1, %v795_v25  ;;  %v887_v44 = vadd.f32 %v875_v19, %v838_v24  ;;  %v3715_v24 = vld [vmem:[#allocation46_spill] sm:$0xff] }
 0x18c   :  { %1371 = vrot.lane.b32.xlu0 %v2995_v20, %s1810_s16  ;;  %v1649_v46 = vunpack.i.l.bf16 %v3712_v51  ;;  %v890_v48 = vadd.f32 %v878_v50, %v841_v29  ;;  %v880_v13 = vmul.f32 %v2874_v30, %v3713_v9  ;;  %v925_v14 = vadd.f32 %v3714_v3, %v888_v0  ;;  %v3717_v29 = vld [vmem:[#allocation30_spill] sm:$0xff]  ;;  %v3722_v3 = vld [vmem:[#allocation32_spill] sm:$0xff] }
 0x18d   :  { %v3022_v52 = vpop.permute.xlu1 %953  ;;  %v845_v41 = vadd.f32 %v833_v26, %v796_v57  ;;  %v843_v25 = vadd.f32 %v831_v42, %v2971_v7  ;;  %v847_v37 = vadd.f32 %v835_v58, %v798_v2  ;;  %v961_v1 = vmul.f32 %v2877_v27, %v3715_v24  ;;  %v3716_v57 = vld [vmem:[#allocation14_spill] sm:$0xff]  ;;  %v3720_v42 = vld [vmem:[#allocation41_spill] sm:$0xff]  ;;  %v3721_v58 = vld [vmem:[#allocation40_spill] sm:$0xff] }
 0x18e   :  { %v985_v33 = vpop.permute.xlu0 %984  ;;  %v889_v19 = vadd.f32 %v877_v6, %v840_v55  ;;  %v974_v38 = vadd.f32 %v962_v31, %v925_v14  ;;  %v964_v50 = vmul.f32 %v2877_v27, %v2923_v32  ;;  %v1640_v2 = vunpack.i.h.bf16 %v3716_v57  ;;  %v3718_v32 = vld [vmem:[#allocation45_spill] sm:$0xff]  ;;  %v3068_v26 = vld [vmem:[#allocation2 + $0x118] sm:$0xff] }
 0x18f   :  { %1369 = vrot.lane.b32.xlu1 %v3017_v36, %s1810_s16  ;;  %v1009_v16 = vmul.f32 %v3711_v39, %v985_v33  ;;  %v1650_v0 = vunpack.i.h.bf16 %v3712_v51  ;;  %v879_v55 = vmul.f32 %v1649_v46, %v2874_v30  ;;  %v924_v15 = vadd.f32 %v3717_v29, %v887_v44  ;;  %3719 = vst [vmem:[#allocation19_spill] sm:$0xff] %v3068_v26 }
 0x190   :  { %1375 = vrot.lane.b32.xlu0 %v3024_v5, %s1810_s16  ;;  %v892_v21 = vadd.f32 %v880_v13, %v843_v25  ;;  %v882_v12 = vmul.f32 %v2874_v30, %v3720_v42  ;;  %v927_v33 = vadd.f32 %v3721_v58, %v890_v48  ;;  %v1639_v31 = vunpack.i.l.bf16 %v3716_v57  ;;  %v3723_v25 = vld [vmem:[#allocation37_spill] sm:$0xff] }
 0x191   :  { %v1021_v56 = vadd.f32 %v1009_v16, %v972_v34  ;;  %v3048_v54 = vpop.permute.xlu1 %957  ;;  %v973_v16 = vadd.f32 %v961_v1, %v924_v15  ;;  %v963_v51 = vmul.f32 %v2877_v27, %v2935_v4  ;;  %v926_v14 = vadd.f32 %v3722_v3, %v889_v19 }
 0x192   :  { %v989_v23 = vpop.permute.xlu0 %988  ;;  %v976_v9 = vadd.f32 %v964_v50, %v927_v33  ;;  %v966_v13 = vmul.f32 %v2877_v27, %v2943_v53  ;;  %v881_v4 = vmul.f32 %v1650_v0, %v2874_v30  ;;  %v1654_v24 = vunpack.i.l.bf16 %v3723_v25  ;;  %v3726_v33 = vld [vmem:[#allocation16_spill] sm:$0xff] }
 0x193   :  { %1502 = vst.msk [vmem:[%s3567_s4 + $0x10] sm:$0xff] %vm612_vm1, %v1021_v56  ;;  %1373 = vrot.lane.b32.xlu1 %v3043_v62, %s1810_s16  ;;  %v1011_v7 = vmul.f32 %v3711_v39, %v989_v23  ;;  %v891_v56 = vadd.f32 %v879_v55, %v842_v43  ;;  %v894_v53 = vadd.f32 %v882_v12, %v845_v41  ;;  %v3724_v23 = vld [vmem:[#allocation42_spill] sm:$0xff]  ;;  %v1655_v55 = vunpack.i.h.bf16 %v3723_v25 }
 0x194   :  { %1404 = vrot.lane.b32.xlu0 %v3718_v32, %s1811_s18  ;;  %v884_v19 = vmul.f32 %v2874_v30, %v3724_v23  ;;  %v834_v29 = vmul.f32 %v1639_v31, %v2868_v17  ;;  %v975_v15 = vadd.f32 %v963_v51, %v926_v14  ;;  %v965_v43 = vmul.f32 %v2877_v27, %v2965_v45 }
 0x195   :  { %v1023_v6 = vadd.f32 %v1011_v7, %v974_v38  ;;  %v987_v34 = vpop.permute.xlu1 %986  ;;  %v3725_v38 = vld [vmem:[#allocation34_spill] sm:$0xff]  ;;  %v893_v12 = vadd.f32 %v881_v4, %v3038_v18  ;;  %v883_v58 = vmul.f32 %v1654_v24, %v2874_v30  ;;  %v967_v18 = vmul.f32 %v2877_v27, %v2993_v22  ;;  %v3728_v4 = vld [vmem:[#allocation43_spill] sm:$0xff] }
 0x196   :  { %v1010_v44 = vmul.f32 %v3711_v39, %v987_v34  ;;  %v993_v46 = vpop.permute.xlu0 %992  ;;  %v929_v50 = vadd.f32 %v3725_v38, %v892_v21  ;;  %v968_v21 = vmul.f32 %v2877_v27, %v2973_v35  ;;  %v836_v35 = vmul.f32 %v1640_v2, %v2868_v17 }
 0x197   :  { %1504 = vst.msk [vmem:[%s3567_s4 + $0x40] sm:$0xff] %vm612_vm1, %v1023_v6  ;;  %1377 = vrot.lane.b32.xlu1 %v3068_v26, %s1810_s16  ;;  %v1013_v48 = vmul.f32 %v3711_v39, %v993_v46  ;;  %v928_v6 = vadd.f32 %v3726_v33, %v891_v56  ;;  %v896_v31 = vadd.f32 %v884_v19, %v847_v37 }
 0x198   :  { %v1022_v1 = vadd.f32 %v1010_v44, %v973_v16  ;;  %1408 = vrot.lane.b32.xlu0 %v2917_v47, %s1811_s18  ;;  %v978_v42 = vadd.f32 %v966_v13, %v929_v50  ;;  %v3727_v16 = vld [vmem:[#allocation36_spill] sm:$0xff]  ;;  %v799_v17 = vadd.f32 %v2776_v11, %v2975_v59  ;;  %v970_v2 = vmul.f32 %v2877_v27, %v3004_v63  ;;  %v3729_v59 = vld [vmem:[#allocation38_spill] sm:$0xff] }
 0x199   :  { %v1025_v7 = vadd.f32 %v1013_v48, %v976_v9  ;;  %v991_v57 = vpop.permute.xlu1 %990  ;;  %v931_v51 = vadd.f32 %v3727_v16, %v894_v53  ;;  %v846_v9 = vadd.f32 %v834_v29, %v3002_v61  ;;  %v977_v3 = vadd.f32 %v965_v43, %v928_v6 }
 0x19a   :  { %1503 = vst.msk [vmem:[%s3567_s4 + $0x18] sm:$0x1] %vm614_vm2, %v1022_v1  ;;  %v1012_v41 = vmul.f32 %v3711_v39, %v991_v57  ;;  %v997_v0 = vpop.permute.xlu0 %996  ;;  %v885_v61 = vmul.f32 %v1655_v55, %v2874_v30  ;;  %v930_v56 = vadd.f32 %v3728_v4, %v893_v12  ;;  %v933_v63 = vadd.f32 %v3729_v59, %v896_v31 }
 0x19b   :  { %1506 = vst.msk [vmem:[%s3567_s4 + $0x70] sm:$0xff] %vm612_vm1, %v1025_v7  ;;  %1406 = vrot.lane.b32.xlu1 %v2930_v10, %s1811_s18  ;;  %v1015_v45 = vmul.f32 %v3711_v39, %v997_v0  ;;  %v980_v37 = vadd.f32 %v968_v21, %v931_v51  ;;  %v895_v48 = vadd.f32 %v883_v58, %v846_v9  ;;  %v3730_v7 = vld [vmem:[#allocation27_spill] sm:$0xff] }
 0x19c   :  { %v1024_v34 = vadd.f32 %v1012_v41, %v975_v15  ;;  %1412 = vrot.lane.b32.xlu0 %v2937_v40, %s1811_s18  ;;  %v848_v1 = vadd.f32 %v836_v35, %v799_v17  ;;  %v979_v53 = vadd.f32 %v967_v18, %v930_v56  ;;  %v969_v23 = vmul.f32 %v2877_v27, %v3022_v52  ;;  %v1737_v52 = vld [vmem:[#allocation2 + $0x118] sm:$0xff]  ;;  %v3731_v15 = vld [vmem:[#allocation39_spill] sm:$0xff] }
 0x19d   :  { %v1027_v44 = vadd.f32 %v1015_v45, %v978_v42  ;;  %v995_v46 = vpop.permute.xlu1 %994  ;;  %v982_v38 = vadd.f32 %v970_v2, %v933_v63  ;;  %v922_v57 = vmul.f32 %v1737_v52, %v3730_v7  ;;  %v932_v43 = vadd.f32 %v3731_v15, %v895_v48 }
 0x19e   :  { %1505 = vst.msk [vmem:[%s3567_s4 + $0x48] sm:$0x1] %vm614_vm2, %v1024_v34  ;;  %v1014_v14 = vmul.f32 %v3711_v39, %v995_v46  ;;  %v1001_v13 = vpop.permute.xlu0 %1000  ;;  %v897_v29 = vadd.f32 %v885_v61, %v848_v1  ;;  %v971_v21 = vmul.f32 %v2877_v27, %v3048_v54  ;;  %v3732_v46 = vld [vmem:[#allocation28_spill] sm:$0xff]  ;;  %v3199_v2 = vstv %s1514_s5 }
 0x19f   :  { %1508 = vst.msk [vmem:[%s3567_s4 + $0xa0] sm:$0xff] %vm612_vm1, %v1027_v44  ;;  %1410 = vrot.lane.b32.xlu1 %v2959_v49, %s1811_s18  ;;  %v1017_v22 = vmul.f32 %v3711_v39, %v1001_v13  ;;  %v981_v42 = vadd.f32 %v969_v23, %v932_v43  ;;  %v3193_v44 = vstv %s1492_s27  ;;  %v3733_v13 = vld [vmem:[#allocation23_spill] sm:$0xff] }
 0x1a0   :  { %v1026_v11 = vadd.f32 %v1014_v14, %v977_v3  ;;  %1416 = vrot.lane.b32.xlu0 %v2967_v28, %s1811_s18  ;;  %v934_v58 = vadd.f32 %v922_v57, %v897_v29  ;;  %v1062_v9 = vmul.f32 %v3732_v46, %v3193_v44  ;;  %v1065_v17 = vmul.f32 %v3193_v44, %v3733_v13 }
 0x1a1   :  { %v1029_v25 = vadd.f32 %v1017_v22, %v980_v37  ;;  %v999_v24 = vpop.permute.xlu1 %998  ;;  %v3201_v22 = vstv %s1493_s30 }
 0x1a2   :  { %1507 = vst.msk [vmem:[%s3567_s4 + $0x78] sm:$0x1] %vm614_vm2, %v1026_v11  ;;  %v1016_v30 = vmul.f32 %v3711_v39, %v999_v24  ;;  %v1005_v19 = vpop.permute.xlu0 %1004  ;;  %v983_v54 = vadd.f32 %v971_v21, %v934_v58  ;;  %v1074_v61 = vadd.f32 %v1062_v9, %v3199_v2  ;;  %v3734_v11 = vld [vmem:[#allocation18_spill] sm:$0xff]  ;;  %v1077_v63 = vadd.f32 %v1065_v17, %v3199_v2 }
 0x1a3   :  { %1510 = vst.msk [vmem:[%s3567_s4 + $0xd0] sm:$0xff] %vm612_vm1, %v1029_v25  ;;  %1414 = vrot.lane.b32.xlu1 %v2987_v8, %s1811_s18  ;;  %v1019_v50 = vmul.f32 %v3711_v39, %v1005_v19  ;;  %v1067_v59 = vmul.f32 %v3193_v44, %v3734_v11  ;;  %v3210_v24 = vstv %s1494_s6 }
 0x1a4   :  { %v1028_v41 = vadd.f32 %v1016_v30, %v979_v53  ;;  %1420 = vrot.lane.b32.xlu0 %v2995_v20, %s1811_s18 }
 0x1a5   :  { %v1031_v0 = vadd.f32 %v1019_v50, %v982_v38  ;;  %v1003_v55 = vpop.permute.xlu1 %1002  ;;  %v1079_v29 = vadd.f32 %v1067_v59, %v3199_v2 }
 0x1a6   :  { %1509 = vst.msk [vmem:[%s3567_s4 + $0xa8] sm:$0x1] %vm614_vm2, %v1028_v41  ;;  %v1018_v45 = vmul.f32 %v3711_v39, %v1003_v55  ;;  %v3168_v12 = vpop.permute.xlu0 %1085 }
 0x1a7   :  { %1512 = vst.msk [vmem:[%s3567_s4 + $0x100] sm:$0xff] %vm612_vm1, %v1031_v0  ;;  %1418 = vrot.lane.b32.xlu1 %v3017_v36, %s1811_s18 }
 0x1a8   :  { %v1030_v33 = vadd.f32 %v1018_v45, %v981_v42  ;;  %1424 = vrot.lane.b32.xlu0 %v3024_v5, %s1811_s18  ;;  %v3735_v42 = vld [vmem:[#allocation26_spill] sm:$0xff] }
 0x1a9   :  { %v1007_v27 = vpop.permute.xlu1 %1006  ;;  %v1069_v21 = vmul.f32 %v3193_v44, %v3735_v42 }
 0x1aa   :  { %1511 = vst.msk [vmem:[%s3567_s4 + $0xd8] sm:$0x1] %vm614_vm2, %v1030_v33  ;;  %v1020_v6 = vmul.f32 %v3711_v39, %v1007_v27  ;;  %v3183_v34 = vpop.permute.xlu0 %1089 }
 0x1ab   :  { %1422 = vrot.lane.b32.xlu1 %v3043_v62, %s1811_s18 }
 0x1ac   :  { %v1032_v35 = vadd.f32 %v1020_v6, %v983_v54 }
 0x1ad   :  { %v1658_v31 = vpop.permute.xlu1 %1657 }
 0x1ae   :  { %1513 = vst.msk [vmem:[%s3567_s4 + $0x108] sm:$0x1] %vm614_vm2, %v1032_v35  ;;  %v1663_v16 = vpop.permute.xlu0 %1662  ;;  %v1660_v3 = vunpack.i.h.bf16 %v1658_v31  ;;  %v1659_v18 = vunpack.i.l.bf16 %v1658_v31  ;;  %v3736_v35 = vld [vmem:[#allocation31_spill] sm:$0xff] }
 0x1af   :  { %1426 = vrot.lane.b32.xlu1 %v3068_v26, %s1811_s18  ;;  %v1665_v7 = vunpack.i.h.bf16 %v1663_v16  ;;  %v1664_v45 = vunpack.i.l.bf16 %v1663_v16  ;;  %v1071_v31 = vmul.f32 %v3193_v44, %v3736_v35  ;;  %s1495_s18 = sld [smem:[#allocation7 + $0x15]]  ;;  %v3318_v26 = vstv %s1498_s7 }
 0x1b0   :  { %v1113_v48 = vmul.f32 %v1660_v3, %v3201_v22  ;;  %v1111_v4 = vmul.f32 %v1659_v18, %v3201_v22  ;;  %3744 = vst [vmem:[#allocation35_spill] sm:$0xff] %v3318_v26 }
 0x1b1   :  { %v1094_v39 = vpop.permute.xlu1 %1093  ;;  %v1115_v18 = vmul.f32 %v1664_v45, %v3201_v22 }
 0x1b2   :  { %v1102_v51 = vpop.permute.xlu0 %1101  ;;  %v1114_v25 = vmul.f32 %v3201_v22, %v1094_v39  ;;  %v1125_v30 = vadd.f32 %v1113_v48, %v1074_v61  ;;  %v1123_v19 = vadd.f32 %v1111_v4, %v1074_v61  ;;  %v1117_v39 = vmul.f32 %v1665_v7, %v3201_v22 }
 0x1b3   :  { %v1118_v16 = vmul.f32 %v3201_v22, %v1102_v51 }
 0x1b4   :  { %v1126_v57 = vadd.f32 %v1114_v25, %v1077_v63  ;;  %v1129_v63 = vadd.f32 %v1117_v39, %v1074_v61  ;;  %v1083_v25 = vadd.f32 %v1071_v31, %v3199_v2 }
 0x1b5   :  { %v1098_v14 = vpop.permute.xlu1 %1097 }
 0x1b6   :  { %v1106_v37 = vpop.permute.xlu0 %1105  ;;  %v1116_v43 = vmul.f32 %v3201_v22, %v1098_v14  ;;  %v1081_v14 = vadd.f32 %v1069_v21, %v3199_v2 }
 0x1b8   :  { %v1128_v9 = vadd.f32 %v1116_v43, %v1079_v29 }
 0x1b9   :  { %v1668_v56 = vpop.permute.xlu1 %1667 }
 0x1ba   :  { %v1673_v1 = vpop.permute.xlu0 %1672  ;;  %v1670_v58 = vunpack.i.h.bf16 %v1668_v56  ;;  %v1669_v33 = vunpack.i.l.bf16 %v1668_v56 }
 0x1bb   :  { %v1675_v53 = vunpack.i.h.bf16 %v1673_v1  ;;  %v1674_v23 = vunpack.i.l.bf16 %v1673_v1 }
 0x1bc   :  { %v1121_v13 = vmul.f32 %v1670_v58, %v3201_v22  ;;  %v1119_v17 = vmul.f32 %v1669_v33, %v3201_v22 }
 0x1bd   :  { %v1162_v38 = vmul.f32 %v1675_v53, %v3210_v24  ;;  %v1160_v50 = vmul.f32 %v1674_v23, %v3210_v24  ;;  %v3214_v52 = vpop.permute.xlu1 %1134  ;;  %v1127_v23 = vadd.f32 %v1115_v18, %v1074_v61 }
 0x1be   :  { %v1143_v15 = vpop.permute.xlu0 %1142 }
 0x1bf   :  { %v3218_v41 = vadd.f32 %v1162_v38, %v1125_v30  ;;  %v3220_v0 = vadd.f32 %v1160_v50, %v1123_v19  ;;  %v1163_v55 = vmul.f32 %v3210_v24, %v1143_v15  ;;  %v1130_v30 = vadd.f32 %v1118_v16, %v1081_v14 }
 0x1c0   :  { %v1133_v38 = vadd.f32 %v1121_v13, %v1074_v61  ;;  %v1131_v50 = vadd.f32 %v1119_v17, %v1074_v61  ;;  %v1120_v15 = vmul.f32 %v3201_v22, %v1106_v37 }
 0x1c1   :  { %v3225_v27 = vadd.f32 %v1163_v55, %v1126_v57  ;;  %v3227_v54 = vpop.permute.xlu1 %1138 }
 0x1c2   :  { %v1147_v6 = vpop.permute.xlu0 %1146 }
 0x1c3   :  { %v1165_v3 = vmul.f32 %v3210_v24, %v1147_v6  ;;  %v1132_v6 = vadd.f32 %v1120_v15, %v1083_v25 }
 0x1c5   :  { %v3238_v48 = vadd.f32 %v1165_v3, %v1128_v9  ;;  %v1678_v4 = vpop.permute.xlu1 %1677 }
 0x1c6   :  { %v1680_v56 = vunpack.i.h.bf16 %v1678_v4  ;;  %v1679_v11 = vunpack.i.l.bf16 %v1678_v4  ;;  %v1683_v59 = vpop.permute.xlu0 %1682 }
 0x1c7   :  { %v1685_v1 = vunpack.i.h.bf16 %v1683_v59  ;;  %v1684_v53 = vunpack.i.l.bf16 %v1683_v59 }
 0x1c8   :  { %v1166_v19 = vmul.f32 %v1680_v56, %v3210_v24  ;;  %v1164_v51 = vmul.f32 %v1679_v11, %v3210_v24 }
 0x1c9   :  { %v1170_v7 = vmul.f32 %v1685_v1, %v3210_v24  ;;  %v1168_v57 = vmul.f32 %v1684_v53, %v3210_v24  ;;  %v1151_v29 = vpop.permute.xlu1 %1150 }
 0x1ca   :  { %v3246_v43 = vadd.f32 %v1164_v51, %v1127_v23  ;;  %v3248_v55 = vadd.f32 %v1166_v19, %v1129_v63  ;;  %v1167_v42 = vmul.f32 %v3210_v24, %v1151_v29  ;;  %v3251_v21 = vpop.permute.xlu0 %1220  ;;  %v1738_v23 = vld [vmem:[#allocation2] sm:$0xff]  ;;  %v3739_v19 = vld [vmem:[#allocation17_spill] sm:$0xff]  ;;  %v1195_v29 = vstv %s1495_s18 }
 0x1cb   :  { %v3253_v45 = vadd.f32 %v1170_v7, %v1133_v38  ;;  %v3255_v58 = vadd.f32 %v1168_v57, %v1131_v50  ;;  %v1063_v51 = vmul.f32 %v3193_v44, %v3739_v19  ;;  %v1110_v57 = vmul.f32 %v3201_v22, %v3168_v12  ;;  %v3743_v12 = vld [vmem:[#allocation20_spill] sm:$0xff] }
 0x1cc   :  { %v3257_v61 = vadd.f32 %v1167_v42, %v1130_v30  ;;  %v1061_v30 = vmul.f32 %v1738_v23, %v3193_v44  ;;  %v1112_v42 = vmul.f32 %v3201_v22, %v3183_v34  ;;  %v1159_v44 = vmul.f32 %v3210_v24, %v3214_v52  ;;  %v3742_v23 = vld [vmem:[#allocation29_spill] sm:$0xff] }
 0x1cd   :  { %3737 = vst [vmem:[#allocation21_spill] sm:$0xff] %v3253_v45  ;;  %v1155_v33 = vpop.permute.xlu1 %1154  ;;  %v1075_v15 = vadd.f32 %v1063_v51, %v3199_v2  ;;  %v1200_v19 = vmul.f32 %v1195_v29, %v3743_v12  ;;  %v3745_v34 = vld [vmem:[#allocation13_spill] sm:$0xff]  ;;  %v3333_v12 = vmul.f32 %v3318_v26, %v2917_v47  ;;  %v3353_v47 = vmul.f32 %v3318_v26, %v2967_v28 }
 0x1ce   :  { %v1169_v35 = vmul.f32 %v3210_v24, %v1155_v33  ;;  %v3260_v31 = vpop.permute.xlu0 %1224  ;;  %v1073_v7 = vadd.f32 %v1061_v30, %v3199_v2  ;;  %v1198_v30 = vmul.f32 %v1195_v29, %v3742_v23  ;;  %v1204_v2 = vmul.f32 %v1195_v29, %v3745_v34  ;;  %v3746_v22 = vld [vmem:[#allocation33_spill] sm:$0xff] }
 0x1cf   :  { %v1202_v52 = vmul.f32 %v1195_v29, %v3746_v22  ;;  %v1331_v23 = vmul.f32 %v3318_v26, %v3718_v32  ;;  %v3339_v34 = vmul.f32 %v3318_v26, %v2930_v10  ;;  %v3349_v32 = vmul.f32 %v3318_v26, %v2959_v49 }
 0x1d0   :  { %v3262_v37 = vadd.f32 %v1169_v35, %v1132_v6  ;;  %v3741_v6 = vld [vmem:[#allocation24_spill] sm:$0xff]  ;;  %v1122_v51 = vadd.f32 %v1110_v57, %v1073_v7  ;;  %v3343_v7 = vmul.f32 %v3318_v26, %v2937_v40  ;;  %v3357_v10 = vmul.f32 %v3318_v26, %v2987_v8 }
 0x1d1   :  { %v3264_v39 = vpop.permute.xlu1 %1687  ;;  %v1196_v35 = vmul.f32 %v1195_v29, %v3741_v6  ;;  %v1206_v6 = vmul.f32 %v1195_v29, %v2738_v60  ;;  %v3360_v40 = vmul.f32 %v3732_v46, %v1195_v29  ;;  %v3370_v49 = vmul.f32 %v3318_v26, %v3017_v36 }
 0x1d2   :  { %v3266_v9 = vpop.permute.xlu0 %1692  ;;  %v1171_v60 = vadd.f32 %v1159_v44, %v1122_v51  ;;  %v3376_v8 = vmul.f32 %v3318_v26, %v3024_v5  ;;  %v3380_v46 = vmul.f32 %v3318_v26, %v3043_v62  ;;  %v3384_v29 = vstv %s3304_s9 }
 0x1d3   :  { %v1690_v36 = vunpack.i.h.bf16 %v3264_v39  ;;  %v3389_v22 = vstv %s3311_s10  ;;  %v1209_v5 = vadd.f32 %v3360_v40, %v3220_v0  ;;  %v1211_v62 = vadd.f32 %v3360_v40, %v3218_v41 }
 0x1d4   :  { %3747 = vst [vmem:[#allocation15_spill] sm:$0xff] %v3376_v8  ;;  %3748 = vst [vmem:[#allocation22_spill] sm:$0xff] %v3380_v46  ;;  %v1208_v44 = vadd.f32 %v1196_v35, %v1171_v60  ;;  %v1212_v51 = vadd.f32 %v1200_v19, %v3225_v27  ;;  %v3401_v46 = vstv %s3322_s11  ;;  %v1214_v60 = vadd.f32 %v1202_v52, %v3238_v48 }
 0x1d5   :  { %v3268_v3 = vpop.permute.xlu1 %1228  ;;  %v1695_v0 = vunpack.i.h.bf16 %v3266_v9  ;;  %v1694_v8 = vunpack.i.l.bf16 %v3266_v9  ;;  %v1213_v19 = vadd.f32 %v3360_v40, %v3246_v43  ;;  %v1215_v48 = vadd.f32 %v3360_v40, %v3248_v55 }
 0x1d6   :  { %v3270_v18 = vpop.permute.xlu0 %1236  ;;  %v1216_v9 = vadd.f32 %v1204_v2, %v3257_v61 }
 0x1d9   :  { %v3272_v14 = vpop.permute.xlu1 %1232 }
 0x1da   :  { %v3274_v16 = vpop.permute.xlu0 %1240 }
 0x1dd   :  { %v3276_v13 = vpop.permute.xlu1 %1697 }
 0x1de   :  { %v3278_v17 = vpop.permute.xlu0 %1702 }
 0x1df   :  { %v1704_v41 = vunpack.i.l.bf16 %v3278_v17 }
 0x1e1   :  { %v1270_v4 = vpop.permute.xlu1 %1269  ;;  %v1295_v61 = vmul.f32 %v1704_v41, %v3384_v29 }
 0x1e2   :  { %v3280_v56 = vpop.permute.xlu0 %1277 }
 0x1e5   :  { %v3282_v11 = vpop.permute.xlu1 %1273 }
 0x1e6   :  { %v3284_v59 = vpop.permute.xlu0 %1281 }
 0x1e9   :  { %v3286_v63 = vpop.permute.xlu1 %1707 }
 0x1ea   :  { %v3288_v25 = vpop.permute.xlu0 %1712 }
 0x1eb   :  { %3738 = vst [vmem:[#allocation44_spill] sm:$0xff] %v3288_v25  ;;  %v3335_v25 = vstv %s1496_s8 }
 0x1ec   :  { %v1248_v27 = vmul.f32 %v1690_v36, %v3335_v25  ;;  %v1249_v52 = vmul.f32 %v3335_v25, %v3268_v3  ;;  %v1250_v3 = vmul.f32 %v1694_v8, %v3335_v25 }
 0x1ed   :  { %v3290_v1 = vpop.permute.xlu1 %1285 }
 0x1ee   :  { %v3292_v53 = vpop.permute.xlu0 %1355  ;;  %v1260_v2 = vadd.f32 %v1248_v27, %v1211_v62  ;;  %v1262_v62 = vadd.f32 %v1250_v3, %v1213_v19 }
 0x1ef   :  { %v1380_v36 = vmul.f32 %v3389_v22, %v3292_v53  ;;  %v1255_v53 = vmul.f32 %v3335_v25, %v3274_v16 }
 0x1f1   :  { %v3297_v38 = vpop.permute.xlu1 %1289 }
 0x1f2   :  { %3740 = vst [vmem:[#allocation25_spill] sm:$0xff] %v3297_v38  ;;  %v3299_v50 = vpop.permute.xlu0 %1359  ;;  %v1161_v38 = vmul.f32 %v3210_v24, %v3227_v54  ;;  %v1124_v24 = vadd.f32 %v1112_v42, %v1075_v15  ;;  %v3366_v15 = vmul.f32 %v3318_v26, %v2995_v20  ;;  %v1245_v42 = vmul.f32 %v3335_v25, %v3251_v21 }
 0x1f3   :  { %v1689_v20 = vunpack.i.l.bf16 %v3264_v39 }
 0x1f4   :  { %v1173_v28 = vadd.f32 %v1161_v38, %v1124_v24  ;;  %v1294_v38 = vmul.f32 %v3384_v29, %v1270_v4  ;;  %v1257_v35 = vadd.f32 %v1245_v42, %v1208_v44  ;;  %v1247_v4 = vmul.f32 %v3335_v25, %v3260_v31 }
 0x1f5   :  { %v3313_v33 = vpop.permute.xlu1 %1357  ;;  %v1246_v26 = vmul.f32 %v1689_v20, %v3335_v25  ;;  %v1218_v44 = vadd.f32 %v1206_v6, %v3262_v37  ;;  %v1261_v37 = vadd.f32 %v1249_v52, %v1212_v51 }
 0x1f6   :  { %v3320_v45 = vpop.permute.xlu0 %1363  ;;  %v1210_v39 = vadd.f32 %v1198_v30, %v1173_v28  ;;  %v1306_v42 = vadd.f32 %v1294_v38, %v1257_v35  ;;  %v1296_v30 = vmul.f32 %v3384_v29, %v3282_v11  ;;  %v3424_v28 = vadd.f32 %v3360_v40, %v3255_v58 }
 0x1f7   :  { %v1705_v11 = vunpack.i.h.bf16 %v3278_v17  ;;  %v1258_v55 = vadd.f32 %v1246_v26, %v1209_v5  ;;  %v1252_v38 = vmul.f32 %v1695_v0, %v3335_v25  ;;  %v1298_v58 = vmul.f32 %v3384_v29, %v3280_v56 }
 0x1f8   :  { %v1259_v43 = vadd.f32 %v1247_v4, %v1210_v39  ;;  %v1343_v39 = vadd.f32 %v1331_v23, %v1306_v42  ;;  %v1253_v17 = vmul.f32 %v3335_v25, %v3270_v18  ;;  %v1251_v26 = vmul.f32 %v3335_v25, %v3272_v14 }
 0x1f9   :  { %v3345_v54 = vpop.permute.xlu1 %1361  ;;  %v1297_v8 = vmul.f32 %v1705_v11, %v3384_v29  ;;  %v1382_v56 = vmul.f32 %v3389_v22, %v3299_v50  ;;  %v1264_v51 = vadd.f32 %v1252_v38, %v1215_v48  ;;  %v1307_v0 = vadd.f32 %v1295_v61, %v1258_v55 }
 0x1fa   :  { %v3362_v57 = vpop.permute.xlu0 %1367  ;;  %v1308_v35 = vadd.f32 %v1296_v30, %v1259_v43  ;;  %v1392_v5 = vadd.f32 %v1380_v36, %v1343_v39  ;;  %v1709_v18 = vunpack.i.l.bf16 %v3286_v63  ;;  %v1310_v41 = vadd.f32 %v1298_v58, %v1261_v37 }
 0x1fb   :  { %v1300_v14 = vmul.f32 %v3384_v29, %v3284_v59  ;;  %v1265_v30 = vadd.f32 %v1253_v17, %v1216_v9  ;;  %v1263_v52 = vadd.f32 %v1251_v26, %v1214_v60  ;;  %v1267_v43 = vadd.f32 %v1255_v53, %v1218_v44 }
 0x1fc   :  { %v1345_v16 = vadd.f32 %v3333_v12, %v1308_v35  ;;  %v1381_v50 = vmul.f32 %v3389_v22, %v3313_v33  ;;  %v1309_v48 = vadd.f32 %v1297_v8, %v1260_v2  ;;  %v1384_v36 = vmul.f32 %v3389_v22, %v3320_v45 }
 0x1fd   :  { %v3391_v21 = vpop.permute.xlu1 %1365  ;;  %v1700_v12 = vunpack.i.h.bf16 %v3276_v13  ;;  %v1710_v60 = vunpack.i.h.bf16 %v3286_v63  ;;  %v1299_v9 = vmul.f32 %v1709_v18, %v3384_v29  ;;  %v1344_v33 = vadd.f32 %v3339_v34, %v1307_v0 }
 0x1fe   :  { %v3398_v24 = vpop.permute.xlu0 %1371  ;;  %v1394_v11 = vadd.f32 %v1382_v56, %v1345_v16  ;;  %v1312_v44 = vadd.f32 %v1300_v14, %v1263_v52  ;;  %v1302_v55 = vmul.f32 %v3384_v29, %v3290_v1  ;;  %v1347_v45 = vadd.f32 %v3343_v7, %v1310_v41 }
 0x1ff   :  { %v1699_v61 = vunpack.i.l.bf16 %v3276_v13  ;;  %v1393_v2 = vadd.f32 %v1381_v50, %v1344_v33  ;;  %v1383_v58 = vmul.f32 %v3389_v22, %v3345_v54  ;;  %v1346_v34 = vadd.f32 %v3349_v32, %v1309_v48  ;;  %v3749_v54 = vld [vmem:[#allocation44_spill] sm:$0xff] }
 0x200   :  { %v1396_v39 = vadd.f32 %v1384_v36, %v1347_v45  ;;  %v1386_v37 = vmul.f32 %v3389_v22, %v3362_v57  ;;  %v1301_v1 = vmul.f32 %v1710_v60, %v3384_v29  ;;  %v1311_v7 = vadd.f32 %v1299_v9, %v1262_v62 }
 0x201   :  { %v3415_v31 = vpop.permute.xlu1 %1369  ;;  %v1714_v17 = vunpack.i.l.bf16 %v3749_v54  ;;  %v1314_v53 = vadd.f32 %v1302_v55, %v1265_v30  ;;  %v1349_v8 = vadd.f32 %v3353_v47, %v1312_v44  ;;  %v1254_v56 = vmul.f32 %v1699_v61, %v3335_v25  ;;  %v3752_v55 = vld [vmem:[#allocation15_spill] sm:$0xff] }
 0x202   :  { %v3426_v20 = vpop.permute.xlu0 %1375  ;;  %v1385_v0 = vmul.f32 %v3389_v22, %v3391_v21  ;;  %v1715_v41 = vunpack.i.h.bf16 %v3749_v54  ;;  %v1388_v47 = vmul.f32 %v3389_v22, %v3398_v24  ;;  %v1313_v16 = vadd.f32 %v1301_v1, %v1264_v51 }
 0x203   :  { %v1398_v14 = vadd.f32 %v1386_v37, %v1349_v8  ;;  %v1348_v30 = vadd.f32 %v3357_v10, %v1311_v7  ;;  %v1256_v50 = vmul.f32 %v1700_v12, %v3335_v25  ;;  %v1351_v48 = vadd.f32 %v3366_v15, %v1314_v53  ;;  %v3751_v25 = vld [vmem:[#allocation21_spill] sm:$0xff] }
 0x204   :  { %v1266_v36 = vadd.f32 %v1254_v56, %v3424_v28  ;;  %v1387_v60 = vmul.f32 %v3389_v22, %v3415_v31  ;;  %v1390_v12 = vmul.f32 %v3389_v22, %v3426_v20  ;;  %v1305_v28 = vmul.f32 %v1715_v41, %v3384_v29 }
 0x205   :  { %v3437_v4 = vpop.permute.xlu1 %1373  ;;  %v1400_v15 = vadd.f32 %v1388_v47, %v1351_v48  ;;  %v1350_v33 = vadd.f32 %v3370_v49, %v1313_v16 }
 0x206   :  { %v1405_v6 = vpop.permute.xlu0 %1404  ;;  %v1389_v20 = vmul.f32 %v3389_v22, %v3437_v4 }
 0x207   :  { %v1429_v23 = vmul.f32 %v3401_v46, %v1405_v6  ;;  %v3750_v6 = vld [vmem:[#allocation25_spill] sm:$0xff]  ;;  %v1399_v61 = vadd.f32 %v1387_v60, %v1350_v33 }
 0x208   :  { %v1304_v32 = vmul.f32 %v3384_v29, %v3750_v6 }
 0x209   :  { %v1441_v27 = vadd.f32 %v1429_v23, %v1392_v5  ;;  %v3453_v42 = vpop.permute.xlu1 %1377  ;;  %v1395_v23 = vadd.f32 %v1383_v58, %v1346_v34  ;;  %v3755_v34 = vld [vmem:[#allocation22_spill] sm:$0xff] }
 0x20a   :  { %v1409_v19 = vpop.permute.xlu0 %1408 }
 0x20b   :  { %1515 = vst.msk [vmem:[%s3567_s4 + $0x20] sm:$0xff] %vm612_vm1, %v1441_v27  ;;  %v1431_v59 = vmul.f32 %v3401_v46, %v1409_v19  ;;  %v1303_v27 = vmul.f32 %v1714_v17, %v3384_v29  ;;  %v1316_v19 = vadd.f32 %v1304_v32, %v1267_v43  ;;  %v1219_v43 = vadd.f32 %v3360_v40, %v3751_v25 }
 0x20c   :  { %v1391_v17 = vmul.f32 %v3389_v22, %v3453_v42 }
 0x20d   :  { %v1443_v38 = vadd.f32 %v1431_v59, %v1394_v11  ;;  %v1407_v3 = vpop.permute.xlu1 %1406  ;;  %v1397_v59 = vadd.f32 %v1385_v0, %v1348_v30  ;;  %v1315_v9 = vadd.f32 %v1303_v27, %v1266_v36  ;;  %v1353_v45 = vadd.f32 %v3752_v55, %v1316_v19 }
 0x20e   :  { %v1430_v63 = vmul.f32 %v3401_v46, %v1407_v3  ;;  %v1413_v35 = vpop.permute.xlu0 %1412  ;;  %v1268_v3 = vadd.f32 %v1256_v50, %v1219_v43 }
 0x20f   :  { %1517 = vst.msk [vmem:[%s3567_s4 + $0x50] sm:$0xff] %vm612_vm1, %v1443_v38  ;;  %v1433_v13 = vmul.f32 %v3401_v46, %v1413_v35  ;;  %v1402_v58 = vadd.f32 %v1390_v12, %v1353_v45  ;;  %v3754_v35 = vld [vmem:[#allocation35_spill] sm:$0xff]  ;;  %v1352_v37 = vadd.f32 %v3755_v34, %v1315_v9 }
 0x210   :  { %v1442_v26 = vadd.f32 %v1430_v63, %v1393_v2  ;;  %v3753_v63 = vld [vmem:[#allocation19_spill] sm:$0xff]  ;;  %v1317_v4 = vadd.f32 %v1305_v28, %v1268_v3 }
 0x211   :  { %v1445_v57 = vadd.f32 %v1433_v13, %v1396_v39  ;;  %v1411_v5 = vpop.permute.xlu1 %1410  ;;  %v1342_v39 = vmul.f32 %v3754_v35, %v3753_v63  ;;  %v1401_v54 = vadd.f32 %v1389_v20, %v1352_v37 }
 0x212   :  { %1516 = vst.msk [vmem:[%s3567_s4 + $0x28] sm:$0x1] %vm614_vm2, %v1442_v26  ;;  %v1432_v62 = vmul.f32 %v3401_v46, %v1411_v5  ;;  %v1417_v18 = vpop.permute.xlu0 %1416 }
 0x213   :  { %1519 = vst.msk [vmem:[%s3567_s4 + $0x80] sm:$0xff] %vm612_vm1, %v1445_v57  ;;  %v1435_v21 = vmul.f32 %v3401_v46, %v1417_v18  ;;  %v1354_v53 = vadd.f32 %v1342_v39, %v1317_v4 }
 0x214   :  { %v1444_v52 = vadd.f32 %v1432_v62, %v1395_v23 }
 0x215   :  { %v1447_v11 = vadd.f32 %v1435_v21, %v1398_v14  ;;  %v1415_v24 = vpop.permute.xlu1 %1414  ;;  %v1403_v8 = vadd.f32 %v1391_v17, %v1354_v53 }
 0x216   :  { %1518 = vst.msk [vmem:[%s3567_s4 + $0x58] sm:$0x1] %vm614_vm2, %v1444_v52  ;;  %v1434_v10 = vmul.f32 %v3401_v46, %v1415_v24  ;;  %v1421_v51 = vpop.permute.xlu0 %1420 }
 0x217   :  { %1521 = vst.msk [vmem:[%s3567_s4 + $0xb0] sm:$0xff] %vm612_vm1, %v1447_v11  ;;  %v1437_v31 = vmul.f32 %v3401_v46, %v1421_v51 }
 0x218   :  { %v1446_v44 = vadd.f32 %v1434_v10, %v1397_v59 }
 0x219   :  { %v1449_v40 = vadd.f32 %v1437_v31, %v1400_v15  ;;  %v1419_v38 = vpop.permute.xlu1 %1418 }
 0x21a   :  { %1520 = vst.msk [vmem:[%s3567_s4 + $0x88] sm:$0x1] %vm614_vm2, %v1446_v44  ;;  %v1436_v29 = vmul.f32 %v3401_v46, %v1419_v38  ;;  %v1425_v2 = vpop.permute.xlu0 %1424 }
 0x21b   :  { %1523 = vst.msk [vmem:[%s3567_s4 + $0xe0] sm:$0xff] %vm612_vm1, %v1449_v40  ;;  %v1439_v49 = vmul.f32 %v3401_v46, %v1425_v2 }
 0x21c   :  { %v1448_v13 = vadd.f32 %v1436_v29, %v1399_v61 }
 0x21d   :  { %v1451_v1 = vadd.f32 %v1439_v49, %v1402_v58  ;;  %v1423_v7 = vpop.permute.xlu1 %1422 }
 0x21e   :  { %1522 = vst.msk [vmem:[%s3567_s4 + $0xb8] sm:$0x1] %vm614_vm2, %v1448_v13  ;;  %v1438_v26 = vmul.f32 %v3401_v46, %v1423_v7 }
 0x21f   :  { %1525 = vst.msk [vmem:[%s3567_s4 + $0x110] sm:$0xff] %vm612_vm1, %v1451_v1 }
 0x220   :  { %v1450_v6 = vadd.f32 %v1438_v26, %v1401_v54 }
 0x221   :  { %v1427_v32 = vpop.permute.xlu1 %1426 }
 0x222   :  { %1524 = vst.msk [vmem:[%s3567_s4 + $0xe8] sm:$0x1] %vm614_vm2, %v1450_v6  ;;  %v1440_v22 = vmul.f32 %v3401_v46, %v1427_v32 }
 0x224   :  { %v1452_v42 = vadd.f32 %v1440_v22, %v1403_v8 }
 0x226   :  { %1526 = vst.msk [vmem:[%s3567_s4 + $0x118] sm:$0x1] %vm614_vm2, %v1452_v42 }
 0x227   :  { %1470 = vsyncpa [#allocation4], 1 }
 0x228   :  { %1471 = vsyncpa [#allocation5], 1 }
 0x229   :  { %1472 = vsyncpa [#allocation8], 1 }

</bundles_post_ra>
